<compile_context>
chip_gen: v7x
topology: tpu7x:2x2x1
jax: 0.10.0
libtpu: 0.0.40
codegen_flags: <defaults>
</compile_context>

<pallas_src>
import math
from functools import partial

import jax
import jax.numpy as jnp
from jax.experimental import pallas as pl
from jax.experimental.pallas import tpu as pltpu

INPUT_SIZE = 784    # 784 % 8 == 0 -> usable directly (no 128-padding needed)
HIDDEN_SIZE = 400   # 400 % 8 == 0 -> used unpadded as full-array-dim blocks
OUT_SIZE = 10
PAD_OUT = 128       # lane-dense output slab; real logits live in [:, :10]


def mlp_kernel(x_ref, w1_ref, b1_ref, w2_ref, b2_ref, w3_ref, b3_ref, o_ref):
    # fc1 + ReLU (bf16 operands, f32 accumulation on the MXU)
    h = jnp.dot(x_ref[...], w1_ref[...], preferred_element_type=jnp.float32)
    h = jnp.maximum(h + b1_ref[...], 0.0).astype(jnp.bfloat16)
    # fc2 + ReLU
    h = jnp.dot(h, w2_ref[...], preferred_element_type=jnp.float32)
    h = jnp.maximum(h + b2_ref[...], 0.0).astype(jnp.bfloat16)
    # fc3 (logits, no activation) -> lane-dense f32 output slab
    out = jnp.dot(h, w3_ref[...], preferred_element_type=jnp.float32)
    o_ref[...] = (out + b3_ref[...]).astype(o_ref.dtype)


def _round_up(n, m):
    return -(-n // m) * m


def _choose_tile(batch):
    """Batch tile: big enough to amortize the ~0.35 us per-step overhead, at
    least 2 grid steps for large batches (v7x 2-TC parallel), <= 512 rows so
    the working set stays trivially inside v7x's 64 MiB VMEM."""
    if batch >= 1024:
        return 512
    if batch >= 512:
        return 256
    return max(16, _round_up(batch, 16))   # bf16 packs 2 rows/sublane -> x16


def prepare_params(params):
    """One-time prep: cast weights to bf16 and pad only the 10-wide logit dim.
    Call once at init; reuse the result for every forward pass."""
    w1, b1, w2, b2, w3, b3 = params
    w1_p = w1.astype(jnp.bfloat16)                                    # (784, 400)
    w2_p = w2.astype(jnp.bfloat16)                                    # (400, 400)
    w3_p = jnp.pad(w3, ((0, 0), (0, PAD_OUT - OUT_SIZE))).astype(jnp.bfloat16)  # (400, 128)
    b3_p = jnp.pad(b3, ((0, 0), (0, PAD_OUT - OUT_SIZE)))             # (1, 128) f32
    return (w1_p, b1, w2_p, b2, w3_p, b3_p)


@jax.jit
def net_forward(x, prepared):
    """x: [B, 784] f32, prepared: output of prepare_params. Returns [B, 10] f32."""
    w1_p, b1_p, w2_p, b2_p, w3_p, b3_p = prepared
    B = x.shape[0]

    TB = _choose_tile(B)
    B_pad = _round_up(B, TB)
    grid = (B_pad // TB,)

    # Only per-call input prep: pad batch rows + cast to bf16 (fused under jit).
    x_p = jnp.pad(x, ((0, B_pad - B), (0, 0))).astype(jnp.bfloat16)

    weight_bytes = 2 * (INPUT_SIZE * HIDDEN_SIZE + HIDDEN_SIZE * HIDDEN_SIZE
                        + HIDDEN_SIZE * PAD_OUT)
    bias_bytes = 4 * (2 * HIDDEN_SIZE + PAD_OUT)
    io_bytes = 2 * B_pad * INPUT_SIZE + 4 * B_pad * PAD_OUT
    cost = pl.CostEstimate(
        flops=2 * B_pad * (INPUT_SIZE * HIDDEN_SIZE + HIDDEN_SIZE * HIDDEN_SIZE
                           + HIDDEN_SIZE * PAD_OUT),
        transcendentals=0,
        bytes_accessed=weight_bytes + bias_bytes + io_bytes,
    )

    out_pad = pl.pallas_call(
        mlp_kernel,
        grid=grid,
        in_specs=[
            # Activations: tiled over the batch grid axis (double-buffered).
            pl.BlockSpec((TB, INPUT_SIZE), lambda i: (i, 0)),
            # Weights / biases: constant block index -> DMA'd once, VMEM-resident.
            pl.BlockSpec((INPUT_SIZE, HIDDEN_SIZE), lambda i: (0, 0)),
            pl.BlockSpec((1, HIDDEN_SIZE), lambda i: (0, 0)),
            pl.BlockSpec((HIDDEN_SIZE, HIDDEN_SIZE), lambda i: (0, 0)),
            pl.BlockSpec((1, HIDDEN_SIZE), lambda i: (0, 0)),
            pl.BlockSpec((HIDDEN_SIZE, PAD_OUT), lambda i: (0, 0)),
            pl.BlockSpec((1, PAD_OUT), lambda i: (0, 0)),
        ],
        out_specs=pl.BlockSpec((TB, PAD_OUT), lambda i: (i, 0)),
        out_shape=jax.ShapeDtypeStruct((B_pad, PAD_OUT), jnp.float32),
        compiler_params=pltpu.CompilerParams(
            dimension_semantics=("parallel",),  # shards batch tiles across v7x's 2 TCs
            vmem_limit_bytes=32 << 20,
        ),
        cost_estimate=cost,
    )(x_p, w1_p, b1_p, w2_p, b2_p, w3_p, b3_p)

    # Slice the real batch rows and the 10 real logit lanes back out.
    return out_pad[:B, :OUT_SIZE]


def init_params(key):
    """Deterministic init mimicking PyTorch nn.Linear default:
    U(-1/sqrt(fan_in), 1/sqrt(fan_in)) for both weight and bias.
    Weights stored [in, out] so the kernel computes x @ W + b."""
    def linear(key, fan_in, fan_out):
        kw, kb = jax.random.split(key)
        bound = 1.0 / math.sqrt(fan_in)
        w = jax.random.uniform(kw, (fan_in, fan_out), jnp.float32, -bound, bound)
        b = jax.random.uniform(kb, (1, fan_out), jnp.float32, -bound, bound)
        return w, b

    k1, k2, k3 = jax.random.split(key, 3)
    w1, b1 = linear(k1, INPUT_SIZE, HIDDEN_SIZE)
    w2, b2 = linear(k2, HIDDEN_SIZE, HIDDEN_SIZE)
    w3, b3 = linear(k3, HIDDEN_SIZE, OUT_SIZE)
    return (w1, b1, w2, b2, w3, b3)


def reference_forward(x, params):
    """Pure-JAX reference mirroring the kernel's bf16 operand / f32 accumulate scheme."""
    w1, b1, w2, b2, w3, b3 = params
    h = jnp.dot(x.astype(jnp.bfloat16), w1.astype(jnp.bfloat16),
                preferred_element_type=jnp.float32)
    h = jnp.maximum(h + b1, 0.0).astype(jnp.bfloat16)
    h = jnp.dot(h, w2.astype(jnp.bfloat16), preferred_element_type=jnp.float32)
    h = jnp.maximum(h + b2, 0.0).astype(jnp.bfloat16)
    out = jnp.dot(h, w3.astype(jnp.bfloat16), preferred_element_type=jnp.float32)
    return out + b3


if __name__ == "__main__":
    key = jax.random.PRNGKey(0)
    kx, kp = jax.random.split(key)

    batch = 8  # small demo batch; each row is a flattened 28x28 MNIST image
    x = jax.random.normal(kx, (batch, INPUT_SIZE), jnp.float32)
    params = init_params(kp)

    prepared = prepare_params(params)       # one-time pad + bf16 cast
    out = net_forward(x, prepared)
    out = jax.block_until_ready(out)

    ref = reference_forward(x, params)
    assert out.shape == (batch, OUT_SIZE)
    # bf16 operands -> loosen tolerance vs. the bf16-mirroring reference.
    assert jnp.allclose(out, ref, atol=2e-2, rtol=2e-2), (
        float(jnp.max(jnp.abs(out - ref))))

    print("KERNEL_OK")
</pallas_src>

<mosaic_0001>
module attributes {stable_mosaic.version = 11 : i64} {
  func.func @mlp_kernel(%arg0: i32, %arg1: memref<16x784xbf16, #tpu.memory_space<vmem>>, %arg2: memref<784x400xbf16, #tpu.memory_space<vmem>>, %arg3: memref<1x400xf32, #tpu.memory_space<vmem>>, %arg4: memref<400x400xbf16, #tpu.memory_space<vmem>>, %arg5: memref<1x400xf32, #tpu.memory_space<vmem>>, %arg6: memref<400x128xbf16, #tpu.memory_space<vmem>>, %arg7: memref<1x128xf32, #tpu.memory_space<vmem>>, %arg8: memref<16x128xf32, #tpu.memory_space<vmem>>) attributes {dimension_semantics = [#tpu.dimension_semantics<parallel>], iteration_bounds = array<i64: 1>, scalar_prefetch = 0 : i64, scratch_operands = 0 : i64, tpu.core_type = #tpu.core_type<tc>, window_params = [{transform_indices = @transform_0, window_bounds = array<i64: 16, 784>}, {pipeline_mode = #tpu.pipeline_mode<synchronous>, transform_indices = @transform_1, window_bounds = array<i64: 784, 400>}, {pipeline_mode = #tpu.pipeline_mode<synchronous>, transform_indices = @transform_2, window_bounds = array<i64: 1, 400>}, {pipeline_mode = #tpu.pipeline_mode<synchronous>, transform_indices = @transform_3, window_bounds = array<i64: 400, 400>}, {pipeline_mode = #tpu.pipeline_mode<synchronous>, transform_indices = @transform_4, window_bounds = array<i64: 1, 400>}, {pipeline_mode = #tpu.pipeline_mode<synchronous>, transform_indices = @transform_5, window_bounds = array<i64: 400, 128>}, {pipeline_mode = #tpu.pipeline_mode<synchronous>, transform_indices = @transform_6, window_bounds = array<i64: 1, 128>}, {transform_indices = @transform_7, window_bounds = array<i64: 16, 128>}]} {
    %c0 = arith.constant 0 : index
    %c0_0 = arith.constant 0 : index
    %0 = vector.load %arg1[%c0, %c0_0] : memref<16x784xbf16, #tpu.memory_space<vmem>>, vector<16x784xbf16>
    %c0_1 = arith.constant 0 : index
    %c0_2 = arith.constant 0 : index
    %1 = vector.load %arg2[%c0_1, %c0_2] : memref<784x400xbf16, #tpu.memory_space<vmem>>, vector<784x400xbf16>
    %cst = arith.constant dense<0.000000e+00> : vector<16x400xf32>
    %2 = tpu.matmul %0, %1, %cst {dimension_numbers = #tpu.dot_dimension_numbers<[1], [0], [0], [1], [0, 0, 1, 1], [], []>} : vector<16x784xbf16>, vector<784x400xbf16>, vector<16x400xf32> -> vector<16x400xf32>
    %c0_3 = arith.constant 0 : index
    %c0_4 = arith.constant 0 : index
    %3 = vector.load %arg3[%c0_3, %c0_4] : memref<1x400xf32, #tpu.memory_space<vmem>>, vector<1x400xf32>
    %4 = vector.broadcast %3 : vector<1x400xf32> to vector<16x400xf32>
    %5 = arith.addf %2, %4 : vector<16x400xf32>
    %cst_5 = arith.constant 0.000000e+00 : f32
    %6 = vector.broadcast %cst_5 : f32 to vector<16x400xf32>
    %7 = arith.maximumf %5, %6 : vector<16x400xf32>
    %8 = arith.truncf %7 : vector<16x400xf32> to vector<16x400xbf16>
    %c0_6 = arith.constant 0 : index
    %c0_7 = arith.constant 0 : index
    %9 = vector.load %arg4[%c0_6, %c0_7] : memref<400x400xbf16, #tpu.memory_space<vmem>>, vector<400x400xbf16>
    %cst_8 = arith.constant dense<0.000000e+00> : vector<16x400xf32>
    %10 = tpu.matmul %8, %9, %cst_8 {dimension_numbers = #tpu.dot_dimension_numbers<[1], [0], [0], [1], [0, 0, 1, 1], [], []>} : vector<16x400xbf16>, vector<400x400xbf16>, vector<16x400xf32> -> vector<16x400xf32>
    %c0_9 = arith.constant 0 : index
    %c0_10 = arith.constant 0 : index
    %11 = vector.load %arg5[%c0_9, %c0_10] : memref<1x400xf32, #tpu.memory_space<vmem>>, vector<1x400xf32>
    %12 = vector.broadcast %11 : vector<1x400xf32> to vector<16x400xf32>
    %13 = arith.addf %10, %12 : vector<16x400xf32>
    %cst_11 = arith.constant 0.000000e+00 : f32
    %14 = vector.broadcast %cst_11 : f32 to vector<16x400xf32>
    %15 = arith.maximumf %13, %14 : vector<16x400xf32>
    %16 = arith.truncf %15 : vector<16x400xf32> to vector<16x400xbf16>
    %c0_12 = arith.constant 0 : index
    %c0_13 = arith.constant 0 : index
    %17 = vector.load %arg6[%c0_12, %c0_13] : memref<400x128xbf16, #tpu.memory_space<vmem>>, vector<400x128xbf16>
    %cst_14 = arith.constant dense<0.000000e+00> : vector<16x128xf32>
    %18 = tpu.matmul %16, %17, %cst_14 {dimension_numbers = #tpu.dot_dimension_numbers<[1], [0], [0], [1], [0, 0, 1, 1], [], []>} : vector<16x400xbf16>, vector<400x128xbf16>, vector<16x128xf32> -> vector<16x128xf32>
    %c0_15 = arith.constant 0 : index
    %c0_16 = arith.constant 0 : index
    %19 = vector.load %arg7[%c0_15, %c0_16] : memref<1x128xf32, #tpu.memory_space<vmem>>, vector<1x128xf32>
    %20 = vector.broadcast %19 : vector<1x128xf32> to vector<16x128xf32>
    %21 = arith.addf %18, %20 : vector<16x128xf32>
    %c0_17 = arith.constant 0 : index
    %c0_18 = arith.constant 0 : index
    %22 = vector.load %arg8[%c0_17, %c0_18] : memref<16x128xf32, #tpu.memory_space<vmem>>, vector<16x128xf32>
    tpu.vector_store %arg8[%c0_17, %c0_18], %21 {strides = array<i32>} : memref<16x128xf32, #tpu.memory_space<vmem>>, vector<16x128xf32>,
    return
  }
  func.func @transform_0(%arg0: i32) -> (i32, i32) {
    %c0_i32 = arith.constant 0 : i32
    %c0_i32_0 = arith.constant 0 : i32
    return %arg0, %c0_i32 : i32, i32
  }
  func.func @transform_1(%arg0: i32) -> (i32, i32) {
    %c0_i32 = arith.constant 0 : i32
    %c0_i32_0 = arith.constant 0 : i32
    %c0_i32_1 = arith.constant 0 : i32
    return %c0_i32, %c0_i32_0 : i32, i32
  }
  func.func @transform_2(%arg0: i32) -> (i32, i32) {
    %c0_i32 = arith.constant 0 : i32
    %c0_i32_0 = arith.constant 0 : i32
    %c0_i32_1 = arith.constant 0 : i32
    return %c0_i32, %c0_i32_0 : i32, i32
  }
  func.func @transform_3(%arg0: i32) -> (i32, i32) {
    %c0_i32 = arith.constant 0 : i32
    %c0_i32_0 = arith.constant 0 : i32
    %c0_i32_1 = arith.constant 0 : i32
    return %c0_i32, %c0_i32_0 : i32, i32
  }
  func.func @transform_4(%arg0: i32) -> (i32, i32) {
    %c0_i32 = arith.constant 0 : i32
    %c0_i32_0 = arith.constant 0 : i32
    %c0_i32_1 = arith.constant 0 : i32
    return %c0_i32, %c0_i32_0 : i32, i32
  }
  func.func @transform_5(%arg0: i32) -> (i32, i32) {
    %c0_i32 = arith.constant 0 : i32
    %c0_i32_0 = arith.constant 0 : i32
    %c0_i32_1 = arith.constant 0 : i32
    return %c0_i32, %c0_i32_0 : i32, i32
  }
  func.func @transform_6(%arg0: i32) -> (i32, i32) {
    %c0_i32 = arith.constant 0 : i32
    %c0_i32_0 = arith.constant 0 : i32
    %c0_i32_1 = arith.constant 0 : i32
    return %c0_i32, %c0_i32_0 : i32, i32
  }
  func.func @transform_7(%arg0: i32) -> (i32, i32) {
    %c0_i32 = arith.constant 0 : i32
    %c0_i32_0 = arith.constant 0 : i32
    return %arg0, %c0_i32 : i32, i32
  }
}

</mosaic_0001>

<bundles_post_ra>
// kernel: net_forward.1
= control target key start
LH: loop header
LB: loop body
LE: loop exit
PB: predicated region body
PF: predicated region fallthrough
CT: control target
= control target key end

     0   :  { %vm1268_vm0 = vcmask 130048   ;;  %s4701_s1 = inlined_call_operand.vmem [shape: bf16[784,400], index: 1, kind: input, shape index: {}]   ;;  %s4702_s0 = inlined_call_operand.vmem [shape: bf16[16,784], index: 0, kind: input, shape index: {}]   ;;  %s4703_s3 = inlined_call_operand.vmem [shape: bf16[400,400], index: 3, kind: input, shape index: {}]   ;;  %s4704_s5 = inlined_call_operand.vmem [shape: bf16[400,128], index: 5, kind: input, shape index: {}]   ;;  %s4705_s2 = inlined_call_operand.vmem [shape: f32[1,400], index: 2, kind: input, shape index: {}]   ;;  %s4706_s4 = inlined_call_operand.vmem [shape: f32[1,400], index: 4, kind: input, shape index: {}]   ;;  %s4707_s6 = inlined_call_operand.vmem [shape: f32[1,128], index: 6, kind: input, shape index: {}]   ;;  %s4708_s7 = inlined_call_operand.vmem [shape: f32[16,128], index: 7, kind: output, shape index: {}]  }
   0x1   :  { %v3140_v0 = vld [vmem:[%s4701_s1 + $0x4] ss:$16 sps:$4 sm:$0xff]   ;;  %v3142_v1 = vld [vmem:[%s4701_s1 + $0xc] ss:$16 sps:$4 sm:$0xff]   ;;  %v3144_v2 = vld [vmem:[%s4701_s1] ss:$16 sps:$4 sm:$0xff]  }
   0x2   :  { %1272 = vmatprep.subr.bf16.mxu0 %v3140_v0  ;;  %v3145_v3 = vld [vmem:[%s4701_s1 + $0x8] ss:$16 sps:$4 sm:$0xff]   ;;  %1444 = vmatprep.subr.bf16.mxu1 %v3142_v1  ;;  %v3146_v4 = vld [vmem:[%s4701_s1 + $0x24] ss:$16 sps:$4 sm:$0xff]   ;;  %v3148_v5 = vld [vmem:[%s4701_s1 + $0x2c] ss:$16 sps:$4 sm:$0xff]  }
   0x3   :  { %1273 = vmatpush1.bf16.msra.mxu0 %v3144_v2  ;;  %1445 = vmatpush1.bf16.msra.mxu1 %v3145_v3  ;;  %v3150_v6 = vld [vmem:[%s4701_s1 + $0x20] ss:$16 sps:$4 sm:$0xff]   ;;  %v3151_v7 = vld [vmem:[%s4701_s1 + $0x28] ss:$16 sps:$4 sm:$0xff]   ;;  %v3152_v8 = vld [vmem:[%s4701_s1 + $0x44] ss:$16 sps:$4 sm:$0xff]  }
   0x4   :  { %1274 = vmatprep.subr.bf16.mxu0 %v3146_v4  ;;  %1446 = vmatprep.subr.bf16.mxu1 %v3148_v5  ;;  %v3154_v9 = vld [vmem:[%s4701_s1 + $0x4c] ss:$16 sps:$4 sm:$0xff]   ;;  %v3156_v10 = vld [vmem:[%s4701_s1 + $0x40] ss:$16 sps:$4 sm:$0xff]   ;;  %v3157_v11 = vld [vmem:[%s4701_s1 + $0x48] ss:$16 sps:$4 sm:$0xff]  }
   0x5   :  { %v3158_v12 = vld [vmem:[%s4701_s1 + $0x64] ss:$16 sps:$4 sm:$0xff]   ;;  %v3160_v13 = vld [vmem:[%s4701_s1 + $0x6c] ss:$16 sps:$4 sm:$0xff]   ;;  %v3162_v14 = vld [vmem:[%s4701_s1 + $0x60] ss:$16 sps:$4 sm:$0xff]  }
   0x6   :  { %v3163_v15 = vld [vmem:[%s4701_s1 + $0x68] ss:$16 sps:$4 sm:$0xff]   ;;  %v3164_v16 = vld [vmem:[%s4701_s1 + $0x84] ss:$16 sps:$4 sm:$0xff]   ;;  %v3166_v17 = vld [vmem:[%s4701_s1 + $0x8c] ss:$16 sps:$4 sm:$0xff]  }
   0x7   :  { %1275 = vmatpush1.bf16.msra.mxu0 %v3150_v6  ;;  %1447 = vmatpush1.bf16.msra.mxu1 %v3151_v7  ;;  %v3168_v18 = vld [vmem:[%s4701_s1 + $0x80] ss:$16 sps:$4 sm:$0xff]   ;;  %v3169_v19 = vld [vmem:[%s4701_s1 + $0x88] ss:$16 sps:$4 sm:$0xff]   ;;  %v3170_v20 = vld [vmem:[%s4701_s1 + $0xa4] ss:$16 sps:$4 sm:$0xff]  }
   0x8   :  { %1276 = vmatprep.subr.bf16.mxu0 %v3152_v8  ;;  %1448 = vmatprep.subr.bf16.mxu1 %v3154_v9  ;;  %v3172_v21 = vld [vmem:[%s4701_s1 + $0xac] ss:$16 sps:$4 sm:$0xff]   ;;  %v3174_v22 = vld [vmem:[%s4701_s1 + $0xa0] ss:$16 sps:$4 sm:$0xff]   ;;  %v3175_v23 = vld [vmem:[%s4701_s1 + $0xa8] ss:$16 sps:$4 sm:$0xff]  }
   0x9   :  { %v3176_v24 = vld [vmem:[%s4701_s1 + $0xc4] ss:$16 sps:$4 sm:$0xff]   ;;  %v3178_v25 = vld [vmem:[%s4701_s1 + $0xcc] ss:$16 sps:$4 sm:$0xff]   ;;  %v3180_v26 = vld [vmem:[%s4701_s1 + $0xc0] ss:$16 sps:$4 sm:$0xff]  }
   0xa   :  { %v3181_v27 = vld [vmem:[%s4701_s1 + $0xc8] ss:$16 sps:$4 sm:$0xff]   ;;  %v3182_v28 = vld [vmem:[%s4701_s1 + $0xe4] ss:$16 sps:$4 sm:$0xff]   ;;  %v3184_v29 = vld [vmem:[%s4701_s1 + $0xec] ss:$16 sps:$4 sm:$0xff]  }
   0xb   :  { %1277 = vmatpush1.bf16.msra.mxu0 %v3156_v10  ;;  %1449 = vmatpush1.bf16.msra.mxu1 %v3157_v11  ;;  %v3186_v30 = vld [vmem:[%s4701_s1 + $0xe0] ss:$16 sps:$4 sm:$0xff]   ;;  %v3187_v31 = vld [vmem:[%s4701_s1 + $0xe8] ss:$16 sps:$4 sm:$0xff]   ;;  %v3188_v32 = vld [vmem:[%s4701_s1 + $0x104] ss:$16 sps:$4 sm:$0xff]  }
   0xc   :  { %1278 = vmatprep.subr.bf16.mxu0 %v3158_v12  ;;  %1450 = vmatprep.subr.bf16.mxu1 %v3160_v13  ;;  %v3190_v33 = vld [vmem:[%s4701_s1 + $0x10c] ss:$16 sps:$4 sm:$0xff]   ;;  %v3192_v34 = vld [vmem:[%s4701_s1 + $0x100] ss:$16 sps:$4 sm:$0xff]   ;;  %v3193_v35 = vld [vmem:[%s4701_s1 + $0x108] ss:$16 sps:$4 sm:$0xff]  }
   0xd   :  { %v3194_v36 = vld [vmem:[%s4701_s1 + $0x124] ss:$16 sps:$4 sm:$0xff]   ;;  %v3196_v37 = vld [vmem:[%s4701_s1 + $0x12c] ss:$16 sps:$4 sm:$0xff]   ;;  %v3198_v38 = vld [vmem:[%s4701_s1 + $0x120] ss:$16 sps:$4 sm:$0xff]  }
   0xe   :  { %v3199_v39 = vld [vmem:[%s4701_s1 + $0x128] ss:$16 sps:$4 sm:$0xff]   ;;  %v3200_v40 = vld [vmem:[%s4701_s1 + $0x144] ss:$16 sps:$4 sm:$0xff]   ;;  %v3202_v41 = vld [vmem:[%s4701_s1 + $0x14c] ss:$16 sps:$4 sm:$0xff]  }
   0xf   :  { %1279 = vmatpush1.bf16.msra.mxu0 %v3162_v14  ;;  %1451 = vmatpush1.bf16.msra.mxu1 %v3163_v15  ;;  %v3204_v42 = vld [vmem:[%s4701_s1 + $0x140] ss:$16 sps:$4 sm:$0xff]   ;;  %v3205_v43 = vld [vmem:[%s4701_s1 + $0x148] ss:$16 sps:$4 sm:$0xff]   ;;  %v3206_v44 = vld [vmem:[%s4701_s1 + $0x164] ss:$16 sps:$4 sm:$0xff]  }
  0x10   :  { %1280 = vmatprep.subr.bf16.mxu0 %v3164_v16  ;;  %1452 = vmatprep.subr.bf16.mxu1 %v3166_v17  ;;  %v3208_v45 = vld [vmem:[%s4701_s1 + $0x16c] ss:$16 sps:$4 sm:$0xff]   ;;  %v3210_v46 = vld [vmem:[%s4701_s1 + $0x160] ss:$16 sps:$4 sm:$0xff]   ;;  %v3211_v47 = vld [vmem:[%s4701_s1 + $0x168] ss:$16 sps:$4 sm:$0xff]  }
  0x11   :  { %v3238_v48 = vld [vmem:[%s4702_s0 + $0x4] ss:$28 sps:$4 sm:$0xff]   ;;  %v3214_v50 = vld [vmem:[%s4701_s1 + $0x18c] ss:$16 sps:$4 sm:$0xff]   ;;  %v3217_v52 = vld [vmem:[%s4701_s1 + $0x188] ss:$16 sps:$4 sm:$0xff]  }
  0x12   :  { %v3212_v49 = vld [vmem:[%s4701_s1 + $0x184] ss:$16 sps:$4 sm:$0xff]   ;;  %1304 = vmatprep.mubr.bf16.mxu0 %v3238_v48  ;;  %1476 = vmatprep.mubr.bf16.mxu1 %v3238_v48  ;;  %v3216_v51 = vld [vmem:[%s4701_s1 + $0x180] ss:$16 sps:$4 sm:$0xff]   ;;  %v3220_v54 = vld [vmem:[%s4701_s1 + $0x1ac] ss:$16 sps:$4 sm:$0xff]  }
  0x13   :  { %1281 = vmatpush1.bf16.msra.mxu0 %v3168_v18  ;;  %1453 = vmatpush1.bf16.msra.mxu1 %v3169_v19  ;;  %v3218_v53 = vld [vmem:[%s4701_s1 + $0x1a4] ss:$16 sps:$4 sm:$0xff]   ;;  %v3222_v55 = vld [vmem:[%s4701_s1 + $0x1a0] ss:$16 sps:$4 sm:$0xff]   ;;  %v3223_v56 = vld [vmem:[%s4701_s1 + $0x1a8] ss:$16 sps:$4 sm:$0xff]  }
  0x14   :  { %1282 = vmatprep.subr.bf16.mxu0 %v3170_v20  ;;  %1454 = vmatprep.subr.bf16.mxu1 %v3172_v21  ;;  %v3224_v57 = vld [vmem:[%s4701_s1 + $0x1c4] ss:$16 sps:$4 sm:$0xff]   ;;  %v3226_v58 = vld [vmem:[%s4701_s1 + $0x1cc] ss:$16 sps:$4 sm:$0xff]   ;;  %v3228_v59 = vld [vmem:[%s4701_s1 + $0x1c0] ss:$16 sps:$4 sm:$0xff]  }
  0x15   :  { %v3229_v60 = vld [vmem:[%s4701_s1 + $0x1c8] ss:$16 sps:$4 sm:$0xff]   ;;  %v3230_v61 = vld [vmem:[%s4701_s1 + $0x1e4] ss:$16 sps:$4 sm:$0xff]   ;;  %v3232_v62 = vld [vmem:[%s4701_s1 + $0x1ec] ss:$16 sps:$4 sm:$0xff]  }
  0x16   :  { %v3234_v63 = vld [vmem:[%s4701_s1 + $0x1e0] ss:$16 sps:$4 sm:$0xff]   ;;  %v3235_v0 = vld [vmem:[%s4701_s1 + $0x1e8] ss:$16 sps:$4 sm:$0xff]   ;;  %v3241_v1 = vld [vmem:[%s4701_s1 + $0x204] ss:$16 sps:$4 sm:$0xff]  }
  0x17   :  { %1283 = vmatpush1.bf16.msra.mxu0 %v3174_v22  ;;  %1455 = vmatpush1.bf16.msra.mxu1 %v3175_v23  ;;  %v3244_v2 = vld [vmem:[%s4701_s1 + $0x20c] ss:$16 sps:$4 sm:$0xff]   ;;  %v3239_v4 = vld [vmem:[%s4701_s1 + $0x200] ss:$16 sps:$4 sm:$0xff]   ;;  %v3242_v5 = vld [vmem:[%s4701_s1 + $0x208] ss:$16 sps:$4 sm:$0xff]  }
  0x18   :  { %1284 = vmatprep.subr.bf16.mxu0 %v3176_v24  ;;  %1456 = vmatprep.subr.bf16.mxu1 %v3178_v25  ;;  %v3236_v3 = vld [vmem:[%s4702_s0] ss:$28 sps:$4 sm:$0xff]   ;;  %v3247_v6 = vld [vmem:[%s4701_s1 + $0x224] ss:$16 sps:$4 sm:$0xff]   ;;  %v3248_v9 = vld [vmem:[%s4701_s1 + $0x228] ss:$16 sps:$4 sm:$0xff]  }
  0x19   :  { %v3250_v7 = vld [vmem:[%s4701_s1 + $0x22c] ss:$16 sps:$4 sm:$0xff]   ;;  %v3245_v8 = vld [vmem:[%s4701_s1 + $0x220] ss:$16 sps:$4 sm:$0xff]   ;;  %v3253_v10 = vld [vmem:[%s4701_s1 + $0x244] ss:$16 sps:$4 sm:$0xff]  }
  0x1a   :  { %v3256_v11 = vld [vmem:[%s4701_s1 + $0x24c] ss:$16 sps:$4 sm:$0xff]   ;;  %v3251_v12 = vld [vmem:[%s4701_s1 + $0x240] ss:$16 sps:$4 sm:$0xff]   ;;  %v3254_v13 = vld [vmem:[%s4701_s1 + $0x248] ss:$16 sps:$4 sm:$0xff]  }
  0x1b   :  { %1285 = vmatpush1.bf16.msra.mxu0 %v3180_v26  ;;  %1457 = vmatpush1.bf16.msra.mxu1 %v3181_v27  ;;  %v3259_v14 = vld [vmem:[%s4701_s1 + $0x264] ss:$16 sps:$4 sm:$0xff]   ;;  %v3262_v15 = vld [vmem:[%s4701_s1 + $0x26c] ss:$16 sps:$4 sm:$0xff]   ;;  %v3257_v16 = vld [vmem:[%s4701_s1 + $0x260] ss:$16 sps:$4 sm:$0xff]  }
  0x1c   :  { %1286 = vmatprep.subr.bf16.mxu0 %v3182_v28  ;;  %1458 = vmatprep.subr.bf16.mxu1 %v3184_v29  ;;  %v3260_v17 = vld [vmem:[%s4701_s1 + $0x268] ss:$16 sps:$4 sm:$0xff]   ;;  %v3265_v18 = vld [vmem:[%s4701_s1 + $0x284] ss:$16 sps:$4 sm:$0xff]   ;;  %v3268_v19 = vld [vmem:[%s4701_s1 + $0x28c] ss:$16 sps:$4 sm:$0xff]  }
  0x1d   :  { %v3263_v20 = vld [vmem:[%s4701_s1 + $0x280] ss:$16 sps:$4 sm:$0xff]   ;;  %v3266_v21 = vld [vmem:[%s4701_s1 + $0x288] ss:$16 sps:$4 sm:$0xff]   ;;  %v3271_v22 = vld [vmem:[%s4701_s1 + $0x2a4] ss:$16 sps:$4 sm:$0xff]  }
  0x1e   :  { %v3274_v23 = vld [vmem:[%s4701_s1 + $0x2ac] ss:$16 sps:$4 sm:$0xff]   ;;  %v3269_v24 = vld [vmem:[%s4701_s1 + $0x2a0] ss:$16 sps:$4 sm:$0xff]   ;;  %v3272_v25 = vld [vmem:[%s4701_s1 + $0x2a8] ss:$16 sps:$4 sm:$0xff]  }
  0x1f   :  { %1287 = vmatpush1.bf16.msra.mxu0 %v3186_v30  ;;  %1459 = vmatpush1.bf16.msra.mxu1 %v3187_v31  ;;  %v3277_v26 = vld [vmem:[%s4701_s1 + $0x2c4] ss:$16 sps:$4 sm:$0xff]   ;;  %v3280_v27 = vld [vmem:[%s4701_s1 + $0x2cc] ss:$16 sps:$4 sm:$0xff]   ;;  %v3275_v28 = vld [vmem:[%s4701_s1 + $0x2c0] ss:$16 sps:$4 sm:$0xff]  }
  0x20   :  { %1288 = vmatprep.subr.bf16.mxu0 %v3188_v32  ;;  %1460 = vmatprep.subr.bf16.mxu1 %v3190_v33  ;;  %v3278_v29 = vld [vmem:[%s4701_s1 + $0x2c8] ss:$16 sps:$4 sm:$0xff]   ;;  %v3283_v31 = vld [vmem:[%s4701_s1 + $0x2e4] ss:$16 sps:$4 sm:$0xff]   ;;  %v3286_v32 = vld [vmem:[%s4701_s1 + $0x2ec] ss:$16 sps:$4 sm:$0xff]  }
  0x21   :  { %v3337_v30 = vld [vmem:[%s4702_s0 + $0xc] ss:$28 sps:$4 sm:$0xff]   ;;  %v3281_v33 = vld [vmem:[%s4701_s1 + $0x2e0] ss:$16 sps:$4 sm:$0xff]  }
  0x22   :  { %v3310_v48 = vld [vmem:[%s4701_s1 + $0x36c] ss:$16 sps:$4 sm:$0xff]  }
  0x23   :  { %1289 = vmatpush1.bf16.msra.mxu0 %v3192_v34  ;;  %1461 = vmatpush1.bf16.msra.mxu1 %v3193_v35  ;;  %v3284_v34 = vld [vmem:[%s4701_s1 + $0x2e8] ss:$16 sps:$4 sm:$0xff]   ;;  %v3289_v35 = vld [vmem:[%s4701_s1 + $0x304] ss:$16 sps:$4 sm:$0xff]  }
  0x24   :  { %1290 = vmatprep.subr.bf16.mxu0 %v3194_v36  ;;  %1462 = vmatprep.subr.bf16.mxu1 %v3196_v37  ;;  %v3292_v36 = vld [vmem:[%s4701_s1 + $0x30c] ss:$16 sps:$4 sm:$0xff]   ;;  %v3287_v37 = vld [vmem:[%s4701_s1 + $0x300] ss:$16 sps:$4 sm:$0xff]  }
  0x27   :  { %1291 = vmatpush1.bf16.msra.mxu0 %v3198_v38  ;;  %1463 = vmatpush1.bf16.msra.mxu1 %v3199_v39  ;;  %v3290_v38 = vld [vmem:[%s4701_s1 + $0x308] ss:$16 sps:$4 sm:$0xff]   ;;  %v3295_v39 = vld [vmem:[%s4701_s1 + $0x324] ss:$16 sps:$4 sm:$0xff]  }
  0x28   :  { %1292 = vmatprep.subr.bf16.mxu0 %v3200_v40  ;;  %1464 = vmatprep.subr.bf16.mxu1 %v3202_v41  ;;  %v3298_v40 = vld [vmem:[%s4701_s1 + $0x32c] ss:$16 sps:$4 sm:$0xff]   ;;  %v3293_v41 = vld [vmem:[%s4701_s1 + $0x320] ss:$16 sps:$4 sm:$0xff]  }
  0x2b   :  { %1293 = vmatpush1.bf16.msra.mxu0 %v3204_v42  ;;  %1465 = vmatpush1.bf16.msra.mxu1 %v3205_v43  ;;  %v3296_v42 = vld [vmem:[%s4701_s1 + $0x328] ss:$16 sps:$4 sm:$0xff]   ;;  %v3301_v43 = vld [vmem:[%s4701_s1 + $0x344] ss:$16 sps:$4 sm:$0xff]  }
  0x2c   :  { %1294 = vmatprep.subr.bf16.mxu0 %v3206_v44  ;;  %1466 = vmatprep.subr.bf16.mxu1 %v3208_v45  ;;  %v3304_v44 = vld [vmem:[%s4701_s1 + $0x34c] ss:$16 sps:$4 sm:$0xff]   ;;  %v3299_v45 = vld [vmem:[%s4701_s1 + $0x340] ss:$16 sps:$4 sm:$0xff]  }
  0x2f   :  { %1295 = vmatpush1.bf16.msra.mxu0 %v3210_v46  ;;  %1467 = vmatpush1.bf16.msra.mxu1 %v3211_v47  ;;  %v3302_v46 = vld [vmem:[%s4701_s1 + $0x348] ss:$16 sps:$4 sm:$0xff]   ;;  %v3307_v47 = vld [vmem:[%s4701_s1 + $0x364] ss:$16 sps:$4 sm:$0xff]  }
  0x30   :  { %1296 = vmatprep.subr.bf16.mxu0 %v3212_v49  ;;  %1468 = vmatprep.subr.bf16.mxu1 %v3214_v50  ;;  %v3305_v49 = vld [vmem:[%s4701_s1 + $0x360] ss:$16 sps:$4 sm:$0xff]   ;;  %v3308_v50 = vld [vmem:[%s4701_s1 + $0x368] ss:$16 sps:$4 sm:$0xff]  }
  0x33   :  { %1297 = vmatpush1.bf16.msra.mxu0 %v3216_v51  ;;  %1469 = vmatpush1.bf16.msra.mxu1 %v3217_v52  ;;  %v3313_v51 = vld [vmem:[%s4701_s1 + $0x384] ss:$16 sps:$4 sm:$0xff]   ;;  %v3316_v52 = vld [vmem:[%s4701_s1 + $0x38c] ss:$16 sps:$4 sm:$0xff]  }
  0x34   :  { %1298 = vmatprep.subr.bf16.mxu0 %v3218_v53  ;;  %1470 = vmatprep.subr.bf16.mxu1 %v3220_v54  ;;  %v3311_v53 = vld [vmem:[%s4701_s1 + $0x380] ss:$16 sps:$4 sm:$0xff]   ;;  %v3314_v54 = vld [vmem:[%s4701_s1 + $0x388] ss:$16 sps:$4 sm:$0xff]  }
  0x37   :  { %1299 = vmatpush1.bf16.msra.mxu0 %v3222_v55  ;;  %1471 = vmatpush1.bf16.msra.mxu1 %v3223_v56  ;;  %v3319_v55 = vld [vmem:[%s4701_s1 + $0x3a4] ss:$16 sps:$4 sm:$0xff]   ;;  %v3322_v56 = vld [vmem:[%s4701_s1 + $0x3ac] ss:$16 sps:$4 sm:$0xff]  }
  0x38   :  { %1300 = vmatprep.subr.bf16.mxu0 %v3224_v57  ;;  %1472 = vmatprep.subr.bf16.mxu1 %v3226_v58  ;;  %v3317_v57 = vld [vmem:[%s4701_s1 + $0x3a0] ss:$16 sps:$4 sm:$0xff]   ;;  %v3320_v58 = vld [vmem:[%s4701_s1 + $0x3a8] ss:$16 sps:$4 sm:$0xff]  }
  0x3b   :  { %1301 = vmatpush1.bf16.msra.mxu0 %v3228_v59  ;;  %1473 = vmatpush1.bf16.msra.mxu1 %v3229_v60  ;;  %v3325_v59 = vld [vmem:[%s4701_s1 + $0x3c4] ss:$16 sps:$4 sm:$0xff]   ;;  %v3328_v60 = vld [vmem:[%s4701_s1 + $0x3cc] ss:$16 sps:$4 sm:$0xff]  }
  0x3c   :  { %1302 = vmatprep.subr.bf16.mxu0 %v3230_v61  ;;  %1474 = vmatprep.subr.bf16.mxu1 %v3232_v62  ;;  %v3323_v61 = vld [vmem:[%s4701_s1 + $0x3c0] ss:$16 sps:$4 sm:$0xff]   ;;  %v3326_v62 = vld [vmem:[%s4701_s1 + $0x3c8] ss:$16 sps:$4 sm:$0xff]  }
  0x3f   :  { %1303 = vmatpush1.bf16.msra.mxu0 %v3234_v63  ;;  %1475 = vmatpush1.bf16.msra.mxu1 %v3235_v0  ;;  %v3331_v63 = vld [vmem:[%s4701_s1 + $0x3e4] ss:$16 sps:$4 sm:$0xff]   ;;  %v3334_v0 = vld [vmem:[%s4701_s1 + $0x3ec] ss:$16 sps:$4 sm:$0xff]  }
  0x40   :  { %1315 = vmatprep.subr.bf16.mxu0 %v3241_v1  ;;  %1487 = vmatprep.subr.bf16.mxu1 %v3244_v2  ;;  %v3329_v1 = vld [vmem:[%s4701_s1 + $0x3e0] ss:$16 sps:$4 sm:$0xff]   ;;  %v3332_v2 = vld [vmem:[%s4701_s1 + $0x3e8] ss:$16 sps:$4 sm:$0xff]  }
  0x42   :  { %1305 = vmatmul.mubr.bf16.vlgmr.msra.gmra.mrb[0].mxu0 %v3236_v3  ;;  %1477 = vmatmul.mubr.bf16.vlgmr.msra.gmra.mrb[0].mxu1 %v3236_v3  ;;  %v3340_v3 = vld [vmem:[%s4701_s1 + $0x404] ss:$16 sps:$4 sm:$0xff]  }
  0x43   :  { %1316 = vmatpush1.bf16.msra.mxu0 %v3239_v4  ;;  %1488 = vmatpush1.bf16.msra.mxu1 %v3242_v5  ;;  %v3343_v4 = vld [vmem:[%s4701_s1 + $0x40c] ss:$16 sps:$4 sm:$0xff]   ;;  %v3335_v5 = vld [vmem:[%s4702_s0 + $0x8] ss:$28 sps:$4 sm:$0xff]  }
  0x44   :  { %1317 = vmatprep.subr.bf16.mxu0 %v3247_v6  ;;  %1489 = vmatprep.subr.bf16.mxu1 %v3250_v7  ;;  %v3338_v6 = vld [vmem:[%s4701_s1 + $0x400] ss:$16 sps:$4 sm:$0xff]   ;;  %v3341_v7 = vld [vmem:[%s4701_s1 + $0x408] ss:$16 sps:$4 sm:$0xff]  }
  0x45   :  { %1347 = vmatprep.mubr.bf16.mxu0 %v3337_v30  ;;  %1519 = vmatprep.mubr.bf16.mxu1 %v3337_v30  ;;  %v3379_v30 = vld [vmem:[%s4701_s1 + $0x4cc] ss:$16 sps:$4 sm:$0xff]  }
  0x47   :  { %1318 = vmatpush1.bf16.msra.mxu0 %v3245_v8  ;;  %1490 = vmatpush1.bf16.msra.mxu1 %v3248_v9  ;;  %v3346_v8 = vld [vmem:[%s4701_s1 + $0x424] ss:$16 sps:$4 sm:$0xff]   ;;  %v3349_v9 = vld [vmem:[%s4701_s1 + $0x42c] ss:$16 sps:$4 sm:$0xff]  }
  0x48   :  { %1319 = vmatprep.subr.bf16.mxu0 %v3253_v10  ;;  %1491 = vmatprep.subr.bf16.mxu1 %v3256_v11  ;;  %v3344_v10 = vld [vmem:[%s4701_s1 + $0x420] ss:$16 sps:$4 sm:$0xff]   ;;  %v3347_v11 = vld [vmem:[%s4701_s1 + $0x428] ss:$16 sps:$4 sm:$0xff]  }
  0x4b   :  { %1320 = vmatpush1.bf16.msra.mxu0 %v3251_v12  ;;  %1492 = vmatpush1.bf16.msra.mxu1 %v3254_v13  ;;  %v3436_v12 = vld [vmem:[%s4702_s0 + $0x14] ss:$28 sps:$4 sm:$0xff]  }
  0x4c   :  { %1321 = vmatprep.subr.bf16.mxu0 %v3259_v14  ;;  %1493 = vmatprep.subr.bf16.mxu1 %v3262_v15  ;;  %v3352_v13 = vld [vmem:[%s4701_s1 + $0x444] ss:$16 sps:$4 sm:$0xff]   ;;  %v3355_v14 = vld [vmem:[%s4701_s1 + $0x44c] ss:$16 sps:$4 sm:$0xff]   ;;  %v3350_v15 = vld [vmem:[%s4701_s1 + $0x440] ss:$16 sps:$4 sm:$0xff]  }
  0x4f   :  { %1322 = vmatpush1.bf16.msra.mxu0 %v3257_v16  ;;  %1494 = vmatpush1.bf16.msra.mxu1 %v3260_v17  ;;  %v3353_v16 = vld [vmem:[%s4701_s1 + $0x448] ss:$16 sps:$4 sm:$0xff]   ;;  %v3358_v17 = vld [vmem:[%s4701_s1 + $0x464] ss:$16 sps:$4 sm:$0xff]  }
  0x50   :  { %1323 = vmatprep.subr.bf16.mxu0 %v3265_v18  ;;  %1495 = vmatprep.subr.bf16.mxu1 %v3268_v19  ;;  %v3361_v18 = vld [vmem:[%s4701_s1 + $0x46c] ss:$16 sps:$4 sm:$0xff]   ;;  %v3356_v19 = vld [vmem:[%s4701_s1 + $0x460] ss:$16 sps:$4 sm:$0xff]  }
  0x53   :  { %1324 = vmatpush1.bf16.msra.mxu0 %v3263_v20  ;;  %1496 = vmatpush1.bf16.msra.mxu1 %v3266_v21  ;;  %v3359_v20 = vld [vmem:[%s4701_s1 + $0x468] ss:$16 sps:$4 sm:$0xff]   ;;  %v3364_v21 = vld [vmem:[%s4701_s1 + $0x484] ss:$16 sps:$4 sm:$0xff]  }
  0x54   :  { %1325 = vmatprep.subr.bf16.mxu0 %v3271_v22  ;;  %1497 = vmatprep.subr.bf16.mxu1 %v3274_v23  ;;  %v3367_v22 = vld [vmem:[%s4701_s1 + $0x48c] ss:$16 sps:$4 sm:$0xff]   ;;  %v3362_v23 = vld [vmem:[%s4701_s1 + $0x480] ss:$16 sps:$4 sm:$0xff]  }
  0x57   :  { %1326 = vmatpush1.bf16.msra.mxu0 %v3269_v24  ;;  %1498 = vmatpush1.bf16.msra.mxu1 %v3272_v25  ;;  %v3365_v24 = vld [vmem:[%s4701_s1 + $0x488] ss:$16 sps:$4 sm:$0xff]   ;;  %v3370_v25 = vld [vmem:[%s4701_s1 + $0x4a4] ss:$16 sps:$4 sm:$0xff]  }
  0x58   :  { %1327 = vmatprep.subr.bf16.mxu0 %v3277_v26  ;;  %1499 = vmatprep.subr.bf16.mxu1 %v3280_v27  ;;  %v3373_v26 = vld [vmem:[%s4701_s1 + $0x4ac] ss:$16 sps:$4 sm:$0xff]   ;;  %v3368_v27 = vld [vmem:[%s4701_s1 + $0x4a0] ss:$16 sps:$4 sm:$0xff]  }
  0x5b   :  { %1328 = vmatpush1.bf16.msra.mxu0 %v3275_v28  ;;  %1500 = vmatpush1.bf16.msra.mxu1 %v3278_v29  ;;  %v3371_v28 = vld [vmem:[%s4701_s1 + $0x4a8] ss:$16 sps:$4 sm:$0xff]   ;;  %v3376_v29 = vld [vmem:[%s4701_s1 + $0x4c4] ss:$16 sps:$4 sm:$0xff]  }
  0x5c   :  { %1329 = vmatprep.subr.bf16.mxu0 %v3283_v31  ;;  %1501 = vmatprep.subr.bf16.mxu1 %v3286_v32  ;;  %v3374_v31 = vld [vmem:[%s4701_s1 + $0x4c0] ss:$16 sps:$4 sm:$0xff]   ;;  %v3377_v32 = vld [vmem:[%s4701_s1 + $0x4c8] ss:$16 sps:$4 sm:$0xff]  }
  0x5f   :  { %1330 = vmatpush1.bf16.msra.mxu0 %v3281_v33  ;;  %1502 = vmatpush1.bf16.msra.mxu1 %v3284_v34  ;;  %v3382_v33 = vld [vmem:[%s4701_s1 + $0x4e4] ss:$16 sps:$4 sm:$0xff]   ;;  %v3385_v34 = vld [vmem:[%s4701_s1 + $0x4ec] ss:$16 sps:$4 sm:$0xff]  }
  0x60   :  { %1331 = vmatprep.subr.bf16.mxu0 %v3289_v35  ;;  %1503 = vmatprep.subr.bf16.mxu1 %v3292_v36  ;;  %v3380_v35 = vld [vmem:[%s4701_s1 + $0x4e0] ss:$16 sps:$4 sm:$0xff]   ;;  %v3383_v36 = vld [vmem:[%s4701_s1 + $0x4e8] ss:$16 sps:$4 sm:$0xff]  }
  0x63   :  { %1332 = vmatpush1.bf16.msra.mxu0 %v3287_v37  ;;  %1504 = vmatpush1.bf16.msra.mxu1 %v3290_v38  ;;  %v3388_v37 = vld [vmem:[%s4701_s1 + $0x504] ss:$16 sps:$4 sm:$0xff]   ;;  %v3391_v38 = vld [vmem:[%s4701_s1 + $0x50c] ss:$16 sps:$4 sm:$0xff]  }
  0x64   :  { %1333 = vmatprep.subr.bf16.mxu0 %v3295_v39  ;;  %1505 = vmatprep.subr.bf16.mxu1 %v3298_v40  ;;  %v3386_v39 = vld [vmem:[%s4701_s1 + $0x500] ss:$16 sps:$4 sm:$0xff]   ;;  %v3389_v40 = vld [vmem:[%s4701_s1 + $0x508] ss:$16 sps:$4 sm:$0xff]  }
  0x67   :  { %1334 = vmatpush1.bf16.msra.mxu0 %v3293_v41  ;;  %1506 = vmatpush1.bf16.msra.mxu1 %v3296_v42  ;;  %v3394_v41 = vld [vmem:[%s4701_s1 + $0x524] ss:$16 sps:$4 sm:$0xff]   ;;  %v3397_v42 = vld [vmem:[%s4701_s1 + $0x52c] ss:$16 sps:$4 sm:$0xff]  }
  0x68   :  { %1335 = vmatprep.subr.bf16.mxu0 %v3301_v43  ;;  %1507 = vmatprep.subr.bf16.mxu1 %v3304_v44  ;;  %v3392_v43 = vld [vmem:[%s4701_s1 + $0x520] ss:$16 sps:$4 sm:$0xff]   ;;  %v3395_v44 = vld [vmem:[%s4701_s1 + $0x528] ss:$16 sps:$4 sm:$0xff]  }
  0x6b   :  { %1336 = vmatpush1.bf16.msra.mxu0 %v3299_v45  ;;  %1508 = vmatpush1.bf16.msra.mxu1 %v3302_v46  ;;  %v3400_v45 = vld [vmem:[%s4701_s1 + $0x544] ss:$16 sps:$4 sm:$0xff]   ;;  %v3403_v46 = vld [vmem:[%s4701_s1 + $0x54c] ss:$16 sps:$4 sm:$0xff]  }
  0x6c   :  { %1337 = vmatprep.subr.bf16.mxu0 %v3307_v47  ;;  %1509 = vmatprep.subr.bf16.mxu1 %v3310_v48  ;;  %v3398_v47 = vld [vmem:[%s4701_s1 + $0x540] ss:$16 sps:$4 sm:$0xff]   ;;  %v3401_v48 = vld [vmem:[%s4701_s1 + $0x548] ss:$16 sps:$4 sm:$0xff]  }
  0x6f   :  { %1338 = vmatpush1.bf16.msra.mxu0 %v3305_v49  ;;  %1510 = vmatpush1.bf16.msra.mxu1 %v3308_v50  ;;  %v3406_v49 = vld [vmem:[%s4701_s1 + $0x564] ss:$16 sps:$4 sm:$0xff]   ;;  %v3409_v50 = vld [vmem:[%s4701_s1 + $0x56c] ss:$16 sps:$4 sm:$0xff]  }
  0x70   :  { %1339 = vmatprep.subr.bf16.mxu0 %v3313_v51  ;;  %1511 = vmatprep.subr.bf16.mxu1 %v3316_v52  ;;  %v3404_v51 = vld [vmem:[%s4701_s1 + $0x560] ss:$16 sps:$4 sm:$0xff]   ;;  %v3407_v52 = vld [vmem:[%s4701_s1 + $0x568] ss:$16 sps:$4 sm:$0xff]  }
  0x73   :  { %1340 = vmatpush1.bf16.msra.mxu0 %v3311_v53  ;;  %1512 = vmatpush1.bf16.msra.mxu1 %v3314_v54  ;;  %v3412_v53 = vld [vmem:[%s4701_s1 + $0x584] ss:$16 sps:$4 sm:$0xff]   ;;  %v3415_v54 = vld [vmem:[%s4701_s1 + $0x58c] ss:$16 sps:$4 sm:$0xff]  }
  0x74   :  { %1341 = vmatprep.subr.bf16.mxu0 %v3319_v55  ;;  %1513 = vmatprep.subr.bf16.mxu1 %v3322_v56  ;;  %v3410_v55 = vld [vmem:[%s4701_s1 + $0x580] ss:$16 sps:$4 sm:$0xff]   ;;  %v3413_v56 = vld [vmem:[%s4701_s1 + $0x588] ss:$16 sps:$4 sm:$0xff]  }
  0x77   :  { %1342 = vmatpush1.bf16.msra.mxu0 %v3317_v57  ;;  %1514 = vmatpush1.bf16.msra.mxu1 %v3320_v58  ;;  %v3418_v57 = vld [vmem:[%s4701_s1 + $0x5a4] ss:$16 sps:$4 sm:$0xff]   ;;  %v3421_v58 = vld [vmem:[%s4701_s1 + $0x5ac] ss:$16 sps:$4 sm:$0xff]  }
  0x78   :  { %1343 = vmatprep.subr.bf16.mxu0 %v3325_v59  ;;  %1515 = vmatprep.subr.bf16.mxu1 %v3328_v60  ;;  %v3416_v59 = vld [vmem:[%s4701_s1 + $0x5a0] ss:$16 sps:$4 sm:$0xff]   ;;  %v3419_v60 = vld [vmem:[%s4701_s1 + $0x5a8] ss:$16 sps:$4 sm:$0xff]  }
  0x7b   :  { %1344 = vmatpush1.bf16.msra.mxu0 %v3323_v61  ;;  %1516 = vmatpush1.bf16.msra.mxu1 %v3326_v62  ;;  %v3424_v61 = vld [vmem:[%s4701_s1 + $0x5c4] ss:$16 sps:$4 sm:$0xff]   ;;  %v3427_v62 = vld [vmem:[%s4701_s1 + $0x5cc] ss:$16 sps:$4 sm:$0xff]  }
  0x7c   :  { %1345 = vmatprep.subr.bf16.mxu0 %v3331_v63  ;;  %1517 = vmatprep.subr.bf16.mxu1 %v3334_v0  ;;  %v3422_v63 = vld [vmem:[%s4701_s1 + $0x5c0] ss:$16 sps:$4 sm:$0xff]   ;;  %v3425_v0 = vld [vmem:[%s4701_s1 + $0x5c8] ss:$16 sps:$4 sm:$0xff]  }
  0x7f   :  { %1346 = vmatpush1.bf16.msra.mxu0 %v3329_v1  ;;  %1518 = vmatpush1.bf16.msra.mxu1 %v3332_v2  ;;  %v3430_v1 = vld [vmem:[%s4701_s1 + $0x5e4] ss:$16 sps:$4 sm:$0xff]   ;;  %v3433_v2 = vld [vmem:[%s4701_s1 + $0x5ec] ss:$16 sps:$4 sm:$0xff]  }
  0x80   :  { %1358 = vmatprep.subr.bf16.mxu0 %v3340_v3  ;;  %1530 = vmatprep.subr.bf16.mxu1 %v3343_v4  ;;  %v3428_v3 = vld [vmem:[%s4701_s1 + $0x5e0] ss:$16 sps:$4 sm:$0xff]   ;;  %v3431_v4 = vld [vmem:[%s4701_s1 + $0x5e8] ss:$16 sps:$4 sm:$0xff]  }
  0x82   :  { %1348 = vmatmul.mubr.bf16.vlgmr.msra.gmra.mrb[0].mxu0 %v3335_v5  ;;  %1520 = vmatmul.mubr.bf16.vlgmr.msra.gmra.mrb[0].mxu1 %v3335_v5  ;;  %v3439_v5 = vld [vmem:[%s4701_s1 + $0x604] ss:$16 sps:$4 sm:$0xff]  }
  0x83   :  { %1359 = vmatpush1.bf16.msra.mxu0 %v3338_v6  ;;  %1531 = vmatpush1.bf16.msra.mxu1 %v3341_v7  ;;  %v3442_v6 = vld [vmem:[%s4701_s1 + $0x60c] ss:$16 sps:$4 sm:$0xff]  }
  0x84   :  { %1360 = vmatprep.subr.bf16.mxu0 %v3346_v8  ;;  %1532 = vmatprep.subr.bf16.mxu1 %v3349_v9  ;;  %v3434_v7 = vld [vmem:[%s4702_s0 + $0x10] ss:$28 sps:$4 sm:$0xff]   ;;  %v3440_v9 = vld [vmem:[%s4701_s1 + $0x608] ss:$16 sps:$4 sm:$0xff]  }
  0x85   :  { %1390 = vmatprep.mubr.bf16.mxu0 %v3436_v12  ;;  %1562 = vmatprep.mubr.bf16.mxu1 %v3436_v12  ;;  %v3437_v8 = vld [vmem:[%s4701_s1 + $0x600] ss:$16 sps:$4 sm:$0xff]   ;;  %v3619_v12 = vmov 0  }
  0x87   :  { %1361 = vmatpush1.bf16.msra.mxu0 %v3344_v10  ;;  %1533 = vmatpush1.bf16.msra.mxu1 %v3347_v11  ;;  %v3446_v10 = vld [vmem:[%s4703_s3 + $0x4] ss:$16 sps:$4 sm:$0xff]   ;;  %v3449_v11 = vld [vmem:[%s4703_s3 + $0xc] ss:$16 sps:$4 sm:$0xff]  }
  0x88   :  { %1362 = vmatprep.subr.bf16.mxu0 %v3352_v13  ;;  %1534 = vmatprep.subr.bf16.mxu1 %v3355_v14  ;;  %v3443_v13 = vld [vmem:[%s4702_s0 + $0x18] ss:$28 sps:$4 sm:$0xff]   ;;  %v3444_v14 = vld [vmem:[%s4703_s3] ss:$16 sps:$4 sm:$0xff]  }
  0x8b   :  { %1363 = vmatpush1.bf16.msra.mxu0 %v3350_v15  ;;  %1535 = vmatpush1.bf16.msra.mxu1 %v3353_v16  ;;  %v3447_v15 = vld [vmem:[%s4703_s3 + $0x8] ss:$16 sps:$4 sm:$0xff]   ;;  %v3452_v16 = vld [vmem:[%s4703_s3 + $0x24] ss:$16 sps:$4 sm:$0xff]  }
  0x8c   :  { %1364 = vmatprep.subr.bf16.mxu0 %v3358_v17  ;;  %1536 = vmatprep.subr.bf16.mxu1 %v3361_v18  ;;  %v3455_v17 = vld [vmem:[%s4703_s3 + $0x2c] ss:$16 sps:$4 sm:$0xff]   ;;  %v3450_v18 = vld [vmem:[%s4703_s3 + $0x20] ss:$16 sps:$4 sm:$0xff]  }
  0x8f   :  { %1365 = vmatpush1.bf16.msra.mxu0 %v3356_v19  ;;  %1537 = vmatpush1.bf16.msra.mxu1 %v3359_v20  ;;  %v3453_v19 = vld [vmem:[%s4703_s3 + $0x28] ss:$16 sps:$4 sm:$0xff]   ;;  %v3458_v20 = vld [vmem:[%s4703_s3 + $0x44] ss:$16 sps:$4 sm:$0xff]  }
  0x90   :  { %1366 = vmatprep.subr.bf16.mxu0 %v3364_v21  ;;  %1538 = vmatprep.subr.bf16.mxu1 %v3367_v22  ;;  %v3461_v21 = vld [vmem:[%s4703_s3 + $0x4c] ss:$16 sps:$4 sm:$0xff]   ;;  %v3456_v22 = vld [vmem:[%s4703_s3 + $0x40] ss:$16 sps:$4 sm:$0xff]  }
  0x93   :  { %1367 = vmatpush1.bf16.msra.mxu0 %v3362_v23  ;;  %1539 = vmatpush1.bf16.msra.mxu1 %v3365_v24  ;;  %v3459_v23 = vld [vmem:[%s4703_s3 + $0x48] ss:$16 sps:$4 sm:$0xff]   ;;  %v3464_v24 = vld [vmem:[%s4703_s3 + $0x64] ss:$16 sps:$4 sm:$0xff]  }
  0x94   :  { %1368 = vmatprep.subr.bf16.mxu0 %v3370_v25  ;;  %1540 = vmatprep.subr.bf16.mxu1 %v3373_v26  ;;  %v3467_v25 = vld [vmem:[%s4703_s3 + $0x6c] ss:$16 sps:$4 sm:$0xff]   ;;  %v3462_v26 = vld [vmem:[%s4703_s3 + $0x60] ss:$16 sps:$4 sm:$0xff]  }
  0x97   :  { %1369 = vmatpush1.bf16.msra.mxu0 %v3368_v27  ;;  %1541 = vmatpush1.bf16.msra.mxu1 %v3371_v28  ;;  %v3465_v27 = vld [vmem:[%s4703_s3 + $0x68] ss:$16 sps:$4 sm:$0xff]   ;;  %v3470_v28 = vld [vmem:[%s4703_s3 + $0x84] ss:$16 sps:$4 sm:$0xff]  }
  0x98   :  { %1370 = vmatprep.subr.bf16.mxu0 %v3376_v29  ;;  %1542 = vmatprep.subr.bf16.mxu1 %v3379_v30  ;;  %v3473_v29 = vld [vmem:[%s4703_s3 + $0x8c] ss:$16 sps:$4 sm:$0xff]   ;;  %v3468_v30 = vld [vmem:[%s4703_s3 + $0x80] ss:$16 sps:$4 sm:$0xff]  }
  0x9b   :  { %1371 = vmatpush1.bf16.msra.mxu0 %v3374_v31  ;;  %1543 = vmatpush1.bf16.msra.mxu1 %v3377_v32  ;;  %v3471_v31 = vld [vmem:[%s4703_s3 + $0x88] ss:$16 sps:$4 sm:$0xff]   ;;  %v3476_v32 = vld [vmem:[%s4703_s3 + $0xa4] ss:$16 sps:$4 sm:$0xff]  }
  0x9c   :  { %1372 = vmatprep.subr.bf16.mxu0 %v3382_v33  ;;  %1544 = vmatprep.subr.bf16.mxu1 %v3385_v34  ;;  %v3479_v33 = vld [vmem:[%s4703_s3 + $0xac] ss:$16 sps:$4 sm:$0xff]   ;;  %v3474_v34 = vld [vmem:[%s4703_s3 + $0xa0] ss:$16 sps:$4 sm:$0xff]  }
  0x9f   :  { %1373 = vmatpush1.bf16.msra.mxu0 %v3380_v35  ;;  %1545 = vmatpush1.bf16.msra.mxu1 %v3383_v36  ;;  %v3477_v35 = vld [vmem:[%s4703_s3 + $0xa8] ss:$16 sps:$4 sm:$0xff]   ;;  %v3482_v36 = vld [vmem:[%s4703_s3 + $0xc4] ss:$16 sps:$4 sm:$0xff]  }
  0xa0   :  { %1374 = vmatprep.subr.bf16.mxu0 %v3388_v37  ;;  %1546 = vmatprep.subr.bf16.mxu1 %v3391_v38  ;;  %v3485_v37 = vld [vmem:[%s4703_s3 + $0xcc] ss:$16 sps:$4 sm:$0xff]   ;;  %v3480_v38 = vld [vmem:[%s4703_s3 + $0xc0] ss:$16 sps:$4 sm:$0xff]  }
  0xa3   :  { %1375 = vmatpush1.bf16.msra.mxu0 %v3386_v39  ;;  %1547 = vmatpush1.bf16.msra.mxu1 %v3389_v40  ;;  %v3483_v39 = vld [vmem:[%s4703_s3 + $0xc8] ss:$16 sps:$4 sm:$0xff]   ;;  %v3488_v40 = vld [vmem:[%s4703_s3 + $0xe4] ss:$16 sps:$4 sm:$0xff]  }
  0xa4   :  { %1376 = vmatprep.subr.bf16.mxu0 %v3394_v41  ;;  %1548 = vmatprep.subr.bf16.mxu1 %v3397_v42  ;;  %v3491_v41 = vld [vmem:[%s4703_s3 + $0xec] ss:$16 sps:$4 sm:$0xff]   ;;  %v3486_v42 = vld [vmem:[%s4703_s3 + $0xe0] ss:$16 sps:$4 sm:$0xff]  }
  0xa7   :  { %1377 = vmatpush1.bf16.msra.mxu0 %v3392_v43  ;;  %1549 = vmatpush1.bf16.msra.mxu1 %v3395_v44  ;;  %v3489_v43 = vld [vmem:[%s4703_s3 + $0xe8] ss:$16 sps:$4 sm:$0xff]   ;;  %v3494_v44 = vld [vmem:[%s4703_s3 + $0x104] ss:$16 sps:$4 sm:$0xff]  }
  0xa8   :  { %1378 = vmatprep.subr.bf16.mxu0 %v3400_v45  ;;  %1550 = vmatprep.subr.bf16.mxu1 %v3403_v46  ;;  %v3497_v45 = vld [vmem:[%s4703_s3 + $0x10c] ss:$16 sps:$4 sm:$0xff]   ;;  %v3492_v46 = vld [vmem:[%s4703_s3 + $0x100] ss:$16 sps:$4 sm:$0xff]  }
  0xab   :  { %1379 = vmatpush1.bf16.msra.mxu0 %v3398_v47  ;;  %1551 = vmatpush1.bf16.msra.mxu1 %v3401_v48  ;;  %v3495_v47 = vld [vmem:[%s4703_s3 + $0x108] ss:$16 sps:$4 sm:$0xff]   ;;  %v3500_v48 = vld [vmem:[%s4703_s3 + $0x124] ss:$16 sps:$4 sm:$0xff]  }
  0xac   :  { %1380 = vmatprep.subr.bf16.mxu0 %v3406_v49  ;;  %1552 = vmatprep.subr.bf16.mxu1 %v3409_v50  ;;  %v3503_v49 = vld [vmem:[%s4703_s3 + $0x12c] ss:$16 sps:$4 sm:$0xff]   ;;  %v3498_v50 = vld [vmem:[%s4703_s3 + $0x120] ss:$16 sps:$4 sm:$0xff]  }
  0xaf   :  { %1381 = vmatpush1.bf16.msra.mxu0 %v3404_v51  ;;  %1553 = vmatpush1.bf16.msra.mxu1 %v3407_v52  ;;  %v3501_v51 = vld [vmem:[%s4703_s3 + $0x128] ss:$16 sps:$4 sm:$0xff]   ;;  %v3506_v52 = vld [vmem:[%s4703_s3 + $0x144] ss:$16 sps:$4 sm:$0xff]  }
  0xb0   :  { %1382 = vmatprep.subr.bf16.mxu0 %v3412_v53  ;;  %1554 = vmatprep.subr.bf16.mxu1 %v3415_v54  ;;  %v3509_v53 = vld [vmem:[%s4703_s3 + $0x14c] ss:$16 sps:$4 sm:$0xff]   ;;  %v3504_v54 = vld [vmem:[%s4703_s3 + $0x140] ss:$16 sps:$4 sm:$0xff]  }
  0xb3   :  { %1383 = vmatpush1.bf16.msra.mxu0 %v3410_v55  ;;  %1555 = vmatpush1.bf16.msra.mxu1 %v3413_v56  ;;  %v3507_v55 = vld [vmem:[%s4703_s3 + $0x148] ss:$16 sps:$4 sm:$0xff]   ;;  %v3512_v56 = vld [vmem:[%s4703_s3 + $0x164] ss:$16 sps:$4 sm:$0xff]  }
  0xb4   :  { %1384 = vmatprep.subr.bf16.mxu0 %v3418_v57  ;;  %1556 = vmatprep.subr.bf16.mxu1 %v3421_v58  ;;  %v3515_v57 = vld [vmem:[%s4703_s3 + $0x16c] ss:$16 sps:$4 sm:$0xff]   ;;  %v3510_v58 = vld [vmem:[%s4703_s3 + $0x160] ss:$16 sps:$4 sm:$0xff]  }
  0xb7   :  { %1385 = vmatpush1.bf16.msra.mxu0 %v3416_v59  ;;  %1557 = vmatpush1.bf16.msra.mxu1 %v3419_v60  ;;  %v3513_v59 = vld [vmem:[%s4703_s3 + $0x168] ss:$16 sps:$4 sm:$0xff]   ;;  %v3518_v60 = vld [vmem:[%s4703_s3 + $0x184] ss:$16 sps:$4 sm:$0xff]  }
  0xb8   :  { %1386 = vmatprep.subr.bf16.mxu0 %v3424_v61  ;;  %1558 = vmatprep.subr.bf16.mxu1 %v3427_v62  ;;  %v3521_v61 = vld [vmem:[%s4703_s3 + $0x18c] ss:$16 sps:$4 sm:$0xff]   ;;  %v3516_v62 = vld [vmem:[%s4703_s3 + $0x180] ss:$16 sps:$4 sm:$0xff]  }
  0xbb   :  { %1387 = vmatpush1.bf16.msra.mxu0 %v3422_v63  ;;  %1559 = vmatpush1.bf16.msra.mxu1 %v3425_v0  ;;  %v3519_v63 = vld [vmem:[%s4703_s3 + $0x188] ss:$16 sps:$4 sm:$0xff]   ;;  %v3524_v0 = vld [vmem:[%s4703_s3 + $0x1a4] ss:$16 sps:$4 sm:$0xff]  }
  0xbc   :  { %1388 = vmatprep.subr.bf16.mxu0 %v3430_v1  ;;  %1560 = vmatprep.subr.bf16.mxu1 %v3433_v2  ;;  %v3527_v1 = vld [vmem:[%s4703_s3 + $0x1ac] ss:$16 sps:$4 sm:$0xff]   ;;  %v3522_v2 = vld [vmem:[%s4703_s3 + $0x1a0] ss:$16 sps:$4 sm:$0xff]  }
  0xbf   :  { %1389 = vmatpush1.bf16.msra.mxu0 %v3428_v3  ;;  %1561 = vmatpush1.bf16.msra.mxu1 %v3431_v4  ;;  %v3525_v3 = vld [vmem:[%s4703_s3 + $0x1a8] ss:$16 sps:$4 sm:$0xff]   ;;  %v3530_v4 = vld [vmem:[%s4703_s3 + $0x1c4] ss:$16 sps:$4 sm:$0xff]  }
  0xc0   :  { %1401 = vmatprep.subr.bf16.mxu0 %v3439_v5  ;;  %1573 = vmatprep.subr.bf16.mxu1 %v3442_v6  ;;  %v3533_v5 = vld [vmem:[%s4703_s3 + $0x1cc] ss:$16 sps:$4 sm:$0xff]   ;;  %v3528_v6 = vld [vmem:[%s4703_s3 + $0x1c0] ss:$16 sps:$4 sm:$0xff]  }
  0xc2   :  { %1391 = vmatmul.mubr.bf16.vlgmr.msra.gmra.mrb[0].mxu0 %v3434_v7  ;;  %1563 = vmatmul.mubr.bf16.vlgmr.msra.gmra.mrb[0].mxu1 %v3434_v7  ;;  %v3531_v7 = vld [vmem:[%s4703_s3 + $0x1c8] ss:$16 sps:$4 sm:$0xff]  }
  0xc3   :  { %1402 = vmatpush1.bf16.msra.mxu0 %v3437_v8  ;;  %1574 = vmatpush1.bf16.msra.mxu1 %v3440_v9  ;;  %v3536_v8 = vld [vmem:[%s4703_s3 + $0x1e4] ss:$16 sps:$4 sm:$0xff]   ;;  %v3539_v9 = vld [vmem:[%s4703_s3 + $0x1ec] ss:$16 sps:$4 sm:$0xff]  }
  0xc4   :  { %1433 = vmatprep.mubr.bf16.mxu0 %v3619_v12  ;;  %1605 = vmatprep.mubr.bf16.mxu1 %v3619_v12 }
  0xc5   :  { %2253 = vmatprep.subr.bf16.mxu0 %v3446_v10  ;;  %2339 = vmatprep.subr.bf16.mxu1 %v3449_v11  ;;  %v3534_v10 = vld [vmem:[%s4703_s3 + $0x1e0] ss:$16 sps:$4 sm:$0xff]   ;;  %v3537_v11 = vld [vmem:[%s4703_s3 + $0x1e8] ss:$16 sps:$4 sm:$0xff]  }
  0xce   :  { %2938 = vmatmul.mubr.msk.bf16.vlgmr.msra.gmra.mrb[0].mxu0 %vm1268_vm0, %v3443_v13  ;;  %2939 = vmatmul.mubr.msk.bf16.vlgmr.msra.gmra.mrb[0].mxu1 %vm1268_vm0, %v3443_v13  ;;  %v3542_v13 = vld [vmem:[%s4703_s3 + $0x204] ss:$16 sps:$4 sm:$0xff]  }
  0xcf   :  { %2254 = vmatpush1.bf16.msra.mxu0 %v3444_v14  ;;  %2340 = vmatpush1.bf16.msra.mxu1 %v3447_v15  ;;  %v3545_v14 = vld [vmem:[%s4703_s3 + $0x20c] ss:$16 sps:$4 sm:$0xff]   ;;  %v233_v15 = vlaneseq }
  0xd0   :  { %2255 = vmatprep.subr.bf16.mxu0 %v3452_v16  ;;  %2341 = vmatprep.subr.bf16.mxu1 %v3455_v17 }
  0xd1   :  { %v4471_v16 = vshrl.u32 %v233_v15, 7  ;;  %v3576_v15 = vld [vmem:[%s4703_s3 + $0x2c0] ss:$16 sps:$4 sm:$0xff]  }
  0xd3   :  { %2256 = vmatpush1.bf16.msra.mxu0 %v3450_v18  ;;  %2342 = vmatpush1.bf16.msra.mxu1 %v3453_v19  ;;  %v235_v17 = vsub.s32 0, %v4471_v16  ;;  %v243_v18 = vsub.s32 2, %v4471_v16  ;;  %v231_v19 = vld [vmem:[%s4705_s2] sm:$0xf] }
  0xd4   :  { %2257 = vmatprep.subr.bf16.mxu0 %v3458_v20  ;;  %2343 = vmatprep.subr.bf16.mxu1 %v3461_v21  ;;  %v239_v20 = vsub.s32 1, %v4471_v16  ;;  %v247_v21 = vsub.s32 3, %v4471_v16 }
  0xd7   :  { %2258 = vmatpush1.bf16.msra.mxu0 %v3456_v22  ;;  %2344 = vmatpush1.bf16.msra.mxu1 %v3459_v23  ;;  %v236_v22 = vrot.slane %v231_v19, %v235_v17  ;;  %v244_v23 = vrot.slane %v231_v19, %v243_v18 }
  0xd8   :  { %2259 = vmatprep.subr.bf16.mxu0 %v3464_v24  ;;  %2345 = vmatprep.subr.bf16.mxu1 %v3467_v25  ;;  %v240_v24 = vrot.slane %v231_v19, %v239_v20  ;;  %v248_v25 = vrot.slane %v231_v19, %v247_v21  ;;  %v3579_v19 = vld [vmem:[%s4703_s3 + $0x2c8] ss:$16 sps:$4 sm:$0xff]  }
  0xdb   :  { %2260 = vmatpush1.bf16.msra.mxu0 %v3462_v26  ;;  %2346 = vmatpush1.bf16.msra.mxu1 %v3465_v27 }
  0xdc   :  { %2261 = vmatprep.subr.bf16.mxu0 %v3470_v28  ;;  %2347 = vmatprep.subr.bf16.mxu1 %v3473_v29 }
  0xdf   :  { %2262 = vmatpush1.bf16.msra.mxu0 %v3468_v30  ;;  %2348 = vmatpush1.bf16.msra.mxu1 %v3471_v31 }
  0xe0   :  { %2263 = vmatprep.subr.bf16.mxu0 %v3476_v32  ;;  %2349 = vmatprep.subr.bf16.mxu1 %v3479_v33 }
  0xe3   :  { %2264 = vmatpush1.bf16.msra.mxu0 %v3474_v34  ;;  %2350 = vmatpush1.bf16.msra.mxu1 %v3477_v35 }
  0xe4   :  { %2265 = vmatprep.subr.bf16.mxu0 %v3482_v36  ;;  %2351 = vmatprep.subr.bf16.mxu1 %v3485_v37 }
  0xe7   :  { %2266 = vmatpush1.bf16.msra.mxu0 %v3480_v38  ;;  %2352 = vmatpush1.bf16.msra.mxu1 %v3483_v39 }
  0xe8   :  { %2267 = vmatprep.subr.bf16.mxu0 %v3488_v40  ;;  %2353 = vmatprep.subr.bf16.mxu1 %v3491_v41 }
  0xeb   :  { %2268 = vmatpush1.bf16.msra.mxu0 %v3486_v42  ;;  %2354 = vmatpush1.bf16.msra.mxu1 %v3489_v43 }
  0xec   :  { %2269 = vmatprep.subr.bf16.mxu0 %v3494_v44  ;;  %2355 = vmatprep.subr.bf16.mxu1 %v3497_v45 }
  0xef   :  { %2270 = vmatpush1.bf16.msra.mxu0 %v3492_v46  ;;  %2356 = vmatpush1.bf16.msra.mxu1 %v3495_v47 }
  0xf0   :  { %2271 = vmatprep.subr.bf16.mxu0 %v3500_v48  ;;  %2357 = vmatprep.subr.bf16.mxu1 %v3503_v49 }
  0xf3   :  { %2272 = vmatpush1.bf16.msra.mxu0 %v3498_v50  ;;  %2358 = vmatpush1.bf16.msra.mxu1 %v3501_v51 }
  0xf4   :  { %2273 = vmatprep.subr.bf16.mxu0 %v3506_v52  ;;  %2359 = vmatprep.subr.bf16.mxu1 %v3509_v53 }
  0xf7   :  { %2274 = vmatpush1.bf16.msra.mxu0 %v3504_v54  ;;  %2360 = vmatpush1.bf16.msra.mxu1 %v3507_v55  ;;  %v3540_v54 = vld [vmem:[%s4703_s3 + $0x200] ss:$16 sps:$4 sm:$0xff]   ;;  %v3543_v55 = vld [vmem:[%s4703_s3 + $0x208] ss:$16 sps:$4 sm:$0xff]  }
  0xf8   :  { %2275 = vmatprep.subr.bf16.mxu0 %v3512_v56  ;;  %2361 = vmatprep.subr.bf16.mxu1 %v3515_v57  ;;  %v3548_v56 = vld [vmem:[%s4703_s3 + $0x224] ss:$16 sps:$4 sm:$0xff]   ;;  %v3551_v57 = vld [vmem:[%s4703_s3 + $0x22c] ss:$16 sps:$4 sm:$0xff]  }
  0xfb   :  { %2276 = vmatpush1.bf16.msra.mxu0 %v3510_v58  ;;  %2362 = vmatpush1.bf16.msra.mxu1 %v3513_v59  ;;  %v3546_v58 = vld [vmem:[%s4703_s3 + $0x220] ss:$16 sps:$4 sm:$0xff]   ;;  %v3549_v59 = vld [vmem:[%s4703_s3 + $0x228] ss:$16 sps:$4 sm:$0xff]  }
  0xfc   :  { %2277 = vmatprep.subr.bf16.mxu0 %v3518_v60  ;;  %2363 = vmatprep.subr.bf16.mxu1 %v3521_v61  ;;  %v3554_v60 = vld [vmem:[%s4703_s3 + $0x244] ss:$16 sps:$4 sm:$0xff]   ;;  %v3557_v61 = vld [vmem:[%s4703_s3 + $0x24c] ss:$16 sps:$4 sm:$0xff]  }
  0xff   :  { %2278 = vmatpush1.bf16.msra.mxu0 %v3516_v62  ;;  %2364 = vmatpush1.bf16.msra.mxu1 %v3519_v63  ;;  %v3552_v62 = vld [vmem:[%s4703_s3 + $0x240] ss:$16 sps:$4 sm:$0xff]   ;;  %v3555_v63 = vld [vmem:[%s4703_s3 + $0x248] ss:$16 sps:$4 sm:$0xff]  }
 0x100   :  { %2279 = vmatprep.subr.bf16.mxu0 %v3524_v0  ;;  %2365 = vmatprep.subr.bf16.mxu1 %v3527_v1  ;;  %v3560_v0 = vld [vmem:[%s4703_s3 + $0x264] ss:$16 sps:$4 sm:$0xff]   ;;  %v3563_v1 = vld [vmem:[%s4703_s3 + $0x26c] ss:$16 sps:$4 sm:$0xff]  }
 0x103   :  { %2280 = vmatpush1.bf16.msra.mxu0 %v3522_v2  ;;  %2366 = vmatpush1.bf16.msra.mxu1 %v3525_v3  ;;  %v3558_v2 = vld [vmem:[%s4703_s3 + $0x260] ss:$16 sps:$4 sm:$0xff]   ;;  %v3561_v3 = vld [vmem:[%s4703_s3 + $0x268] ss:$16 sps:$4 sm:$0xff]  }
 0x104   :  { %2281 = vmatprep.subr.bf16.mxu0 %v3530_v4  ;;  %2367 = vmatprep.subr.bf16.mxu1 %v3533_v5  ;;  %v3566_v4 = vld [vmem:[%s4703_s3 + $0x284] ss:$16 sps:$4 sm:$0xff]   ;;  %v3569_v5 = vld [vmem:[%s4703_s3 + $0x28c] ss:$16 sps:$4 sm:$0xff]  }
 0x107   :  { %2282 = vmatpush1.bf16.msra.mxu0 %v3528_v6  ;;  %2368 = vmatpush1.bf16.msra.mxu1 %v3531_v7  ;;  %v3564_v6 = vld [vmem:[%s4703_s3 + $0x280] ss:$16 sps:$4 sm:$0xff]   ;;  %v3567_v7 = vld [vmem:[%s4703_s3 + $0x288] ss:$16 sps:$4 sm:$0xff]  }
 0x108   :  { %2283 = vmatprep.subr.bf16.mxu0 %v3536_v8  ;;  %2369 = vmatprep.subr.bf16.mxu1 %v3539_v9  ;;  %v3572_v8 = vld [vmem:[%s4703_s3 + $0x2a4] ss:$16 sps:$4 sm:$0xff]   ;;  %v3575_v9 = vld [vmem:[%s4703_s3 + $0x2ac] ss:$16 sps:$4 sm:$0xff]  }
 0x10b   :  { %2284 = vmatpush1.bf16.msra.mxu0 %v3534_v10  ;;  %2370 = vmatpush1.bf16.msra.mxu1 %v3537_v11  ;;  %v3570_v10 = vld [vmem:[%s4703_s3 + $0x2a0] ss:$16 sps:$4 sm:$0xff]   ;;  %v3573_v11 = vld [vmem:[%s4703_s3 + $0x2a8] ss:$16 sps:$4 sm:$0xff]  }
 0x10c   :  { %2296 = vmatprep.subr.bf16.mxu0 %v3542_v13  ;;  %2382 = vmatprep.subr.bf16.mxu1 %v3545_v14  ;;  %v3578_v13 = vld [vmem:[%s4703_s3 + $0x2c4] ss:$16 sps:$4 sm:$0xff]   ;;  %v3581_v14 = vld [vmem:[%s4703_s3 + $0x2cc] ss:$16 sps:$4 sm:$0xff]  }
 0x1a1   :  { %v1435_v26 = vpop.f32.mrb[0].mxu0  ;;  %v1607_v27 = vpop.f32.mrb[0].mxu1 }
 0x1a2   :  { %v3091_v28 = vadd.f32 %v1435_v26, %v236_v22  ;;  %v3095_v29 = vadd.f32 %v1607_v27, %v244_v23  ;;  %v1437_v30 = vpop.f32.mrb[1].mxu0  ;;  %v1609_v31 = vpop.f32.mrb[1].mxu1  ;;  %v3590_v26 = vld [vmem:[%s4703_s3 + $0x304] ss:$16 sps:$4 sm:$0xff]   ;;  %v3593_v27 = vld [vmem:[%s4703_s3 + $0x30c] ss:$16 sps:$4 sm:$0xff]  }
 0x1a3   :  { %v3092_v32 = vadd.f32 %v1437_v30, %v240_v24  ;;  %v3096_v33 = vadd.f32 %v1609_v31, %v248_v25  ;;  %v1439_v34 = vpop.f32.mrb[2].mxu0  ;;  %v1611_v35 = vpop.f32.mrb[2].mxu1  ;;  %v3595_v30 = vld [vmem:[%s4704_s5 + $0x40] sm:$0xff]  }
 0x1a4   :  { %v3093_v36 = vadd.f32 %v1439_v34, %v236_v22  ;;  %v3097_v37 = vadd.f32 %v1611_v35, %v244_v23  ;;  %v1441_v38 = vpop.f32.mrb[3].mxu0  ;;  %v1613_v39 = vpop.f32.mrb[3].mxu1  ;;  %v1616_v42 = vmax.f32 %v3091_v28, 0.0  ;;  %v1618_v43 = vmax.f32 %v3095_v29, 0.0  ;;  %v3584_v22 = vld [vmem:[%s4703_s3 + $0x2e4] ss:$16 sps:$4 sm:$0xff]  }
 0x1a5   :  { %v3094_v40 = vadd.f32 %v1441_v38, %v240_v24  ;;  %v3098_v41 = vadd.f32 %v1613_v39, %v248_v25  ;;  %v1617_v46 = vmax.f32 %v3092_v32, 0.0  ;;  %v1619_v47 = vmax.f32 %v3096_v33, 0.0  ;;  %v3587_v23 = vld [vmem:[%s4703_s3 + $0x2ec] ss:$16 sps:$4 sm:$0xff]   ;;  %v3582_v24 = vld [vmem:[%s4703_s3 + $0x2e0] ss:$16 sps:$4 sm:$0xff]  }
 0x1a6   :  { %v1620_v44 = vmax.f32 %v3093_v36, 0.0  ;;  %v1622_v45 = vmax.f32 %v3097_v37, 0.0  ;;  %v3585_v25 = vld [vmem:[%s4703_s3 + $0x2e8] ss:$16 sps:$4 sm:$0xff]   ;;  %v3588_v28 = vld [vmem:[%s4703_s3 + $0x300] ss:$16 sps:$4 sm:$0xff]  }
 0x1a7   :  { %v1621_v48 = vmax.f32 %v3094_v40, 0.0  ;;  %v1623_v49 = vmax.f32 %v3098_v41, 0.0  ;;  %v3591_v29 = vld [vmem:[%s4703_s3 + $0x308] ss:$16 sps:$4 sm:$0xff]   ;;  %v3594_v31 = vld [vmem:[%s4704_s5 + $0x80] sm:$0xff]   ;;  %v3601_v36 = vld [vmem:[%s4704_s5 + $0x50] sm:$0xff]  }
 0x1a8   :  { %v1624_v50 = vpack.c.bf16 %v1620_v44, %v1616_v42  ;;  %v4488_v51 = vpack.c.bf16 %v1622_v45, %v1618_v43  ;;  %v3596_v32 = vld [vmem:[%s4704_s5] sm:$0xff]   ;;  %v3598_v33 = vld [vmem:[%s4704_s5 + $0x48] sm:$0xff]   ;;  %v3600_v37 = vld [vmem:[%s4704_s5 + $0x90] sm:$0xff]  }
 0x1a9   :  { %v1625_v52 = vpack.c.bf16 %v1621_v48, %v1617_v46  ;;  %v1627_v53 = vpack.c.bf16 %v1623_v49, %v1619_v47  ;;  %v3597_v34 = vld [vmem:[%s4704_s5 + $0x88] sm:$0xff]   ;;  %v3602_v38 = vld [vmem:[%s4704_s5 + $0x10] sm:$0xff]   ;;  %v3604_v39 = vld [vmem:[%s4704_s5 + $0x58] sm:$0xff]  }
 0x1aa   :  { %v3599_v35 = vld [vmem:[%s4704_s5 + $0x8] sm:$0xff]   ;;  %v3603_v40 = vld [vmem:[%s4704_s5 + $0x98] sm:$0xff]   ;;  %v3607_v42 = vld [vmem:[%s4704_s5 + $0x60] sm:$0xff]  }
 0x1ab   :  { %2285 = vmatprep.mubr.bf16.mxu0 %v1625_v52  ;;  %2371 = vmatprep.mubr.bf16.mxu1 %v1625_v52  ;;  %v3605_v41 = vld [vmem:[%s4704_s5 + $0x18] sm:$0xff]   ;;  %v3606_v43 = vld [vmem:[%s4704_s5 + $0xa0] sm:$0xff]   ;;  %v3610_v45 = vld [vmem:[%s4704_s5 + $0x68] sm:$0xff]  }
 0x1ac   :  { %2286 = vmatmul.mubr.bf16.vlgmr.msra.gmra.mrb[4].mxu0 %v1624_v50  ;;  %2372 = vmatmul.mubr.bf16.vlgmr.msra.gmra.mrb[4].mxu1 %v1624_v50  ;;  %v3608_v44 = vld [vmem:[%s4704_s5 + $0x20] sm:$0xff]   ;;  %v3609_v46 = vld [vmem:[%s4704_s5 + $0xa8] sm:$0xff]   ;;  %v3612_v48 = vld [vmem:[%s4704_s5 + $0xb0] sm:$0xff]  }
 0x1ad   :  { %2297 = vmatpush1.bf16.msra.mxu0 %v3540_v54  ;;  %2383 = vmatpush1.bf16.msra.mxu1 %v3543_v55  ;;  %v3611_v47 = vld [vmem:[%s4704_s5 + $0x28] sm:$0xff]   ;;  %v3613_v49 = vld [vmem:[%s4704_s5 + $0x70] sm:$0xff]   ;;  %v3616_v52 = vld [vmem:[%s4704_s5 + $0x78] sm:$0xff]  }
 0x1ae   :  { %3040 = vmatprep.mubr.msk.bf16.mxu0 %vm1268_vm0, %v1627_v53  ;;  %3041 = vmatprep.mubr.msk.bf16.mxu1 %vm1268_vm0, %v1627_v53  ;;  %v3614_v50 = vld [vmem:[%s4704_s5 + $0x30] sm:$0xff]   ;;  %v3617_v53 = vld [vmem:[%s4704_s5 + $0x38] sm:$0xff]   ;;  %v3618_v54 = vld [vmem:[%s4704_s5 + $0xc0] sm:$0xff]  }
 0x1af   :  { %2298 = vmatprep.subr.bf16.mxu0 %v3548_v56  ;;  %2384 = vmatprep.subr.bf16.mxu1 %v3551_v57  ;;  %v1728_v55 = vld [vmem:[%s4706_s4] sm:$0xf] }
 0x1b0   :  { %v1733_v56 = vrot.slane %v1728_v55, %v235_v17  ;;  %v1737_v57 = vrot.slane %v1728_v55, %v239_v20 }
 0x1b1   :  { %2299 = vmatpush1.bf16.msra.mxu0 %v3546_v58  ;;  %2385 = vmatpush1.bf16.msra.mxu1 %v3549_v59  ;;  %v1745_v58 = vrot.slane %v1728_v55, %v247_v21 }
 0x1b2   :  { %2300 = vmatprep.subr.bf16.mxu0 %v3554_v60  ;;  %2386 = vmatprep.subr.bf16.mxu1 %v3557_v61 }
 0x1b5   :  { %2301 = vmatpush1.bf16.msra.mxu0 %v3552_v62  ;;  %2387 = vmatpush1.bf16.msra.mxu1 %v3555_v63 }
 0x1b6   :  { %2302 = vmatprep.subr.bf16.mxu0 %v3560_v0  ;;  %2388 = vmatprep.subr.bf16.mxu1 %v3563_v1 }
 0x1b9   :  { %2303 = vmatpush1.bf16.msra.mxu0 %v3558_v2  ;;  %2389 = vmatpush1.bf16.msra.mxu1 %v3561_v3 }
 0x1ba   :  { %2304 = vmatprep.subr.bf16.mxu0 %v3566_v4  ;;  %2390 = vmatprep.subr.bf16.mxu1 %v3569_v5 }
 0x1bd   :  { %2305 = vmatpush1.bf16.msra.mxu0 %v3564_v6  ;;  %2391 = vmatpush1.bf16.msra.mxu1 %v3567_v7 }
 0x1be   :  { %2306 = vmatprep.subr.bf16.mxu0 %v3572_v8  ;;  %2392 = vmatprep.subr.bf16.mxu1 %v3575_v9 }
 0x1c1   :  { %2307 = vmatpush1.bf16.msra.mxu0 %v3570_v10  ;;  %2393 = vmatpush1.bf16.msra.mxu1 %v3573_v11 }
 0x1c2   :  { %2308 = vmatprep.subr.bf16.mxu0 %v3578_v13  ;;  %2394 = vmatprep.subr.bf16.mxu1 %v3581_v14 }
 0x1c5   :  { %2309 = vmatpush1.bf16.msra.mxu0 %v3576_v15  ;;  %2395 = vmatpush1.bf16.msra.mxu1 %v3579_v19 }
 0x1c6   :  { %2310 = vmatprep.subr.bf16.mxu0 %v3584_v22  ;;  %2396 = vmatprep.subr.bf16.mxu1 %v3587_v23 }
 0x1c9   :  { %2311 = vmatpush1.bf16.msra.mxu0 %v3582_v24  ;;  %2397 = vmatpush1.bf16.msra.mxu1 %v3585_v25 }
 0x1ca   :  { %2312 = vmatprep.subr.bf16.mxu0 %v3590_v26  ;;  %2398 = vmatprep.subr.bf16.mxu1 %v3593_v27  ;;  %v3042_v26 = vld [vmem:[%s4707_s6] ss:$0 sm:$0xff] }
 0x1cd   :  { %2313 = vmatpush1.bf16.msra.mxu0 %v3588_v28  ;;  %2399 = vmatpush1.bf16.msra.mxu1 %v3591_v29 }
 0x1ce   :  { %2688 = vmatprep.subr.bf16.mxu1 %v3619_v12  ;;  %3069 = vmatprep.subr.bf16.mxu0 %v3595_v30 }
 0x1d0   :  { %2329 = vmatmul.mubr.bf16.vlgmr.msra.gmra.mrb[4].mxu0 %v4488_v51  ;;  %2415 = vmatmul.mubr.bf16.vlgmr.msra.gmra.mrb[4].mxu1 %v4488_v51  ;;  %v3615_v51 = vld [vmem:[%s4704_s5 + $0xb8] sm:$0xff]  }
 0x1d1   :  { %2689 = vmatpush1.bf16.msra.mxu1 %v3594_v31  ;;  %3070 = vmatpush3.bf16.msra.mxu0 %v3596_v32 }
 0x1d2   :  { %2690 = vmatprep.subr.bf16.mxu1 %v3619_v12  ;;  %3071 = vmatprep.subr.bf16.mxu0 %v3598_v33 }
 0x1d5   :  { %2691 = vmatpush1.bf16.msra.mxu1 %v3597_v34  ;;  %3072 = vmatpush3.bf16.msra.mxu0 %v3599_v35 }
 0x1d6   :  { %2692 = vmatprep.subr.bf16.mxu1 %v3619_v12  ;;  %3073 = vmatprep.subr.bf16.mxu0 %v3601_v36 }
 0x1d9   :  { %2693 = vmatpush1.bf16.msra.mxu1 %v3600_v37  ;;  %3074 = vmatpush3.bf16.msra.mxu0 %v3602_v38 }
 0x1da   :  { %2694 = vmatprep.subr.bf16.mxu1 %v3619_v12  ;;  %3075 = vmatprep.subr.bf16.mxu0 %v3604_v39 }
 0x1dd   :  { %2695 = vmatpush1.bf16.msra.mxu1 %v3603_v40  ;;  %3076 = vmatpush3.bf16.msra.mxu0 %v3605_v41 }
 0x1de   :  { %2696 = vmatprep.subr.bf16.mxu1 %v3619_v12  ;;  %3077 = vmatprep.subr.bf16.mxu0 %v3607_v42 }
 0x1e1   :  { %2697 = vmatpush1.bf16.msra.mxu1 %v3606_v43  ;;  %3078 = vmatpush3.bf16.msra.mxu0 %v3608_v44 }
 0x1e2   :  { %2698 = vmatprep.subr.bf16.mxu1 %v3619_v12  ;;  %3079 = vmatprep.subr.bf16.mxu0 %v3610_v45 }
 0x1e5   :  { %2699 = vmatpush1.bf16.msra.mxu1 %v3609_v46  ;;  %3080 = vmatpush3.bf16.msra.mxu0 %v3611_v47 }
 0x1e6   :  { %2700 = vmatprep.subr.bf16.mxu1 %v3619_v12  ;;  %3081 = vmatprep.subr.bf16.mxu0 %v3613_v49 }
 0x1e9   :  { %2701 = vmatpush1.bf16.msra.mxu1 %v3612_v48  ;;  %3082 = vmatpush3.bf16.msra.mxu0 %v3614_v50 }
 0x1ea   :  { %2702 = vmatprep.subr.bf16.mxu1 %v3619_v12  ;;  %3083 = vmatprep.subr.bf16.mxu0 %v3616_v52 }
 0x1ed   :  { %2703 = vmatpush1.bf16.msra.mxu1 %v3615_v51  ;;  %3084 = vmatpush3.bf16.msra.mxu0 %v3617_v53 }
 0x1ee   :  { %2704 = vmatprep.subr.bf16.mxu1 %v3619_v12  ;;  %v1741_v12 = vrot.slane %v1728_v55, %v243_v18 }
 0x1f1   :  { %2705 = vmatpush1.bf16.msra.mxu1 %v3618_v54 }
 0x2a3   :  { %v2330_v59 = vpop.f32.mrb[4].mxu0  ;;  %v2416_v60 = vpop.f32.mrb[4].mxu1 }
 0x2a4   :  { %v3099_v61 = vadd.f32 %v2330_v59, %v1733_v56  ;;  %v3103_v62 = vadd.f32 %v2416_v60, %v1741_v12  ;;  %v2332_v63 = vpop.f32.mrb[5].mxu0  ;;  %v2418_v0 = vpop.f32.mrb[5].mxu1 }
 0x2a5   :  { %v3100_v1 = vadd.f32 %v2332_v63, %v1737_v57  ;;  %v3104_v2 = vadd.f32 %v2418_v0, %v1745_v58  ;;  %v2334_v3 = vpop.f32.mrb[6].mxu0  ;;  %v2420_v4 = vpop.f32.mrb[6].mxu1 }
 0x2a6   :  { %v3101_v17 = vadd.f32 %v2334_v3, %v1733_v56  ;;  %v3105_v5 = vadd.f32 %v2420_v4, %v1741_v12  ;;  %v2336_v6 = vpop.f32.mrb[7].mxu0  ;;  %v2422_v18 = vpop.f32.mrb[7].mxu1  ;;  %v2425_v20 = vmax.f32 %v3099_v61, 0.0  ;;  %v2427_v9 = vmax.f32 %v3103_v62, 0.0 }
 0x2a7   :  { %v3102_v7 = vadd.f32 %v2336_v6, %v1737_v57  ;;  %v3106_v8 = vadd.f32 %v2422_v18, %v1745_v58  ;;  %v2426_v10 = vmax.f32 %v3100_v1, 0.0  ;;  %v2428_v11 = vmax.f32 %v3104_v2, 0.0 }
 0x2a8   :  { %v2429_v16 = vmax.f32 %v3101_v17, 0.0  ;;  %v2431_v21 = vmax.f32 %v3105_v5, 0.0 }
 0x2a9   :  { %v2430_v13 = vmax.f32 %v3102_v7, 0.0  ;;  %v2432_v14 = vmax.f32 %v3106_v8, 0.0 }
 0x2aa   :  { %v2433_v15 = vpack.c.bf16 %v2429_v16, %v2425_v20  ;;  %v2435_v19 = vpack.c.bf16 %v2431_v21, %v2427_v9 }
 0x2ab   :  { %v2434_v22 = vpack.c.bf16 %v2430_v13, %v2426_v10  ;;  %v2436_v23 = vpack.c.bf16 %v2432_v14, %v2428_v11 }
 0x2ad   :  { %2679 = vmatprep.mubr.bf16.mxu0 %v2434_v22  ;;  %3068 = vmatprep.mubr.msk.bf16.mxu1 %vm1268_vm0, %v2436_v23 }
 0x2ae   :  { %2680 = vmatmul.mubr.bf16.vlgmr.msra.gmra.mrb[8].mxu0 %v2433_v15  ;;  %2721 = vmatmul.mubr.bf16.vlgmr.msra.gmra.mrb[8].mxu1 %v2435_v19 }
 0x381   :  { %v3085_v24 = vpop.f32.mrb[8].mxu0  ;;  %v2722_v25 = vpop.f32.mrb[8].mxu1 }
 0x382   :  { %v3086_v27 = vpop.f32.mrb[9].mxu0  ;;  %v2724_v28 = vpop.f32.mrb[9].mxu1 }
 0x383   :  { %v3087_v29 = vadd.f32 %v3086_v27, %v3085_v24  ;;  %v3088_v30 = vpop.f32.mrb[10].mxu0  ;;  %v2725_v31 = vpop.f32.mrb[10].mxu1 }
 0x384   :  { %v3089_v32 = vpop.f32.mrb[11].mxu0  ;;  %v2727_v33 = vpop.f32.mrb[11].mxu1 }
 0x385   :  { %v2682_v34 = vadd.f32 %v3087_v29, %v3042_v26  ;;  %v3090_v35 = vadd.f32 %v3089_v32, %v3088_v30 }
 0x387   :  { %v2723_v36 = vadd.f32 %v2722_v25, %v2682_v34  ;;  %v2685_v37 = vadd.f32 %v3090_v35, %v3042_v26 }
 0x389   :  { %2729 = vst [vmem:[%s4708_s7] sm:$0xff] %v2723_v36  ;;  %v2726_v38 = vadd.f32 %v2725_v31, %v2685_v37 }
 0x38b   :  { %2730 = vst [vmem:[%s4708_s7 + $0x8] sm:$0xff] %v2726_v38 }

</bundles_post_ra>
